<compile_context>
chip_gen: v7x
topology: tpu7x:2x2x1
jax: 0.10.0
libtpu: 0.0.40
codegen_flags: <defaults>
</compile_context>

<pallas_src>
import functools

import jax
import jax.numpy as jnp
from jax import lax
from jax.experimental import pallas as pl
from jax.experimental.pallas import tpu as pltpu

EPS = 1e-5
SLOPE = 0.2              # LeakyReLU negative slope
LANE = 128               # channel dim padded to a multiple of the lane width


def _leaky(x):
    return jnp.where(x > 0, x, SLOPE * x)


def _round_up(x, m):
    return (x + m - 1) // m * m


def _chip_tuning():
    """Per-generation (max conv1 row tile, vmem_limit_bytes)."""
    try:
        vmem_cap = int(pltpu.get_tpu_info().vmem_capacity_bytes)
    except Exception:                      # no info -> conservative (v7x) budget
        vmem_cap = 64 * 1024 * 1024
    if vmem_cap >= 96 * 1024 * 1024:       # v5e / v6e: 128 MiB physical VMEM
        return 1024, 80 * 1024 * 1024
    return 512, 40 * 1024 * 1024           # v7x: 64 MiB physical VMEM


def _pick_tm(m, tm_max):
    """Balanced row tile: smallest grid with tm <= tm_max, bounded pad waste."""
    k = 1
    while True:
        rows = -(-m // k)
        sub = 16 if rows <= 128 else 128   # >128-row tiles are multiples of 128
        tm = _round_up(rows, sub)          # so the in-kernel chunking divides tm
        if tm <= tm_max:
            return tm, k
        k += 1


# ---------------------------------------------------------------------------
# Pass A: conv1 im2col matmul + BN1 sum / sum-of-squares
# ---------------------------------------------------------------------------
def _conv1_stats_kernel(p_ref, w_ref, y_ref, s_ref, *, nch, chunk):
    @pl.when(pl.program_id(0) == 0)
    def _():
        s_ref[...] = jnp.zeros_like(s_ref)

    def do_chunk(r0):
        y = jnp.dot(p_ref[pl.ds(r0, chunk), :], w_ref[...],
                    preferred_element_type=jnp.float32)
        y_ref[pl.ds(r0, chunk), :] = y.astype(y_ref.dtype)
        s_ref[...] += jnp.concatenate(
            [jnp.sum(y, axis=0, keepdims=True),
             jnp.sum(y * y, axis=0, keepdims=True)], axis=0)

    if nch == 1:
        do_chunk(0)
    else:
        def body(c, carry):
            do_chunk(pl.multiple_of(c * chunk, chunk))
            return carry
        lax.fori_loop(0, nch, body, 0, unroll=True)


def _conv1_pass(p, w, tm, grid_m, vmem_limit):
    m_pad, k = p.shape
    cp = w.shape[1]
    chunk = tm if tm <= 128 else 128
    kernel = functools.partial(_conv1_stats_kernel, nch=tm // chunk, chunk=chunk)
    return pl.pallas_call(
        kernel,
        out_shape=(jax.ShapeDtypeStruct((m_pad, cp), jnp.bfloat16),
                   jax.ShapeDtypeStruct((2, cp), jnp.float32)),
        grid_spec=pltpu.PrefetchScalarGridSpec(
            num_scalar_prefetch=0,
            grid=(grid_m,),
            in_specs=[pl.BlockSpec((tm, k), lambda i: (i, 0)),
                      pl.BlockSpec((k, cp), lambda i: (0, 0))],
            out_specs=[pl.BlockSpec((tm, cp), lambda i: (i, 0)),
                       pl.BlockSpec((2, cp), lambda i: (0, 0))]),
        compiler_params=pltpu.CompilerParams(
            dimension_semantics=("arbitrary",),   # stats accumulate across tiles
            vmem_limit_bytes=vmem_limit),
    )(p, w)


# ---------------------------------------------------------------------------
# Pass B: BN1 affine + LReLU -> x1, conv2 via 9 shifted matmuls, BN2 stats
# ---------------------------------------------------------------------------
def _conv2_fused_kernel(y1_ref, aff_ref, w_ref, x1_ref, y2_ref, s_ref, xpad_ref,
                        *, oh, ow, owp, cp):
    scale = aff_ref[0:1, :]
    shift = aff_ref[1:2, :]
    zrow = jnp.zeros((owp, cp), xpad_ref.dtype)
    zcol = jnp.zeros((1, cp), jnp.float32)
    xpad_ref[0] = zrow
    xpad_ref[oh + 1] = zrow

    def fill(i, carry):
        x1r = _leaky(y1_ref[i].astype(jnp.float32) * scale + shift)    # (ow, cp)
        x1_ref[i] = x1r.astype(x1_ref.dtype)
        xpad_ref[i + 1] = jnp.concatenate([zcol, x1r, zcol],
                                          axis=0).astype(xpad_ref.dtype)
        return carry
    lax.fori_loop(0, oh, fill, 0)

    def conv_row(i, s):
        acc = jnp.zeros((ow, cp), jnp.float32)
        for di in range(3):
            row = xpad_ref[i + di]                                     # (owp, cp)
            for dj in range(3):
                acc += jnp.dot(row[dj:dj + ow, :], w_ref[di * 3 + dj],
                               preferred_element_type=jnp.float32)
        y2_ref[i] = acc.astype(y2_ref.dtype)
        return s + jnp.concatenate([jnp.sum(acc, axis=0, keepdims=True),
                                    jnp.sum(acc * acc, axis=0, keepdims=True)],
                                   axis=0)
    s_ref[...] = lax.fori_loop(0, oh, conv_row,
                               jnp.zeros((2, cp), jnp.float32))


def _conv2_pass(y1, aff1, w2p, vmem_limit):
    n, oh, ow, cp = y1.shape
    owp, ohp = ow + 2, oh + 2
    kernel = functools.partial(_conv2_fused_kernel, oh=oh, ow=ow, owp=owp, cp=cp)
    return pl.pallas_call(
        kernel,
        out_shape=(jax.ShapeDtypeStruct((n, oh, ow, cp), jnp.bfloat16),   # x1
                   jax.ShapeDtypeStruct((n, oh, ow, cp), jnp.bfloat16),   # y2
                   jax.ShapeDtypeStruct((n, 2, cp), jnp.float32)),        # BN2 sums
        grid_spec=pltpu.PrefetchScalarGridSpec(
            num_scalar_prefetch=0,
            grid=(n,),
            in_specs=[pl.BlockSpec((None, oh, ow, cp), lambda b: (b, 0, 0, 0)),
                      pl.BlockSpec((2, cp), lambda b: (0, 0)),
                      pl.BlockSpec((9, cp, cp), lambda b: (0, 0, 0))],
            out_specs=[pl.BlockSpec((None, oh, ow, cp), lambda b: (b, 0, 0, 0)),
                       pl.BlockSpec((None, oh, ow, cp), lambda b: (b, 0, 0, 0)),
                       pl.BlockSpec((None, 2, cp), lambda b: (b, 0, 0))],
            scratch_shapes=[pltpu.VMEM((ohp, owp, cp), jnp.bfloat16)]),
        compiler_params=pltpu.CompilerParams(
            dimension_semantics=("parallel",),
            vmem_limit_bytes=vmem_limit),
    )(y1, aff1, w2p)


# ---------------------------------------------------------------------------
# Pass C: BN2 affine + LReLU, conv3 via 9 shifted matmuls, residual + LReLU
# ---------------------------------------------------------------------------
def _conv3_fused_kernel(y2_ref, aff_ref, w_ref, res_ref, o_ref, xpad_ref,
                        *, oh, ow, owp, cp):
    scale = aff_ref[0:1, :]
    shift = aff_ref[1:2, :]
    zrow = jnp.zeros((owp, cp), xpad_ref.dtype)
    zcol = jnp.zeros((1, cp), jnp.float32)
    xpad_ref[0] = zrow
    xpad_ref[oh + 1] = zrow

    def fill(i, carry):
        x2r = _leaky(y2_ref[i].astype(jnp.float32) * scale + shift)
        xpad_ref[i + 1] = jnp.concatenate([zcol, x2r, zcol],
                                          axis=0).astype(xpad_ref.dtype)
        return carry
    lax.fori_loop(0, oh, fill, 0)

    def conv_row(i, carry):
        acc = jnp.zeros((ow, cp), jnp.float32)
        for di in range(3):
            row = xpad_ref[i + di]
            for dj in range(3):
                acc += jnp.dot(row[dj:dj + ow, :], w_ref[di * 3 + dj],
                               preferred_element_type=jnp.float32)
        o_ref[i] = _leaky(acc + res_ref[i].astype(jnp.float32)).astype(o_ref.dtype)
        return carry
    lax.fori_loop(0, oh, conv_row, 0)


def _conv3_pass(y2, aff2, w3p, x1, vmem_limit):
    n, oh, ow, cp = y2.shape
    owp, ohp = ow + 2, oh + 2
    kernel = functools.partial(_conv3_fused_kernel, oh=oh, ow=ow, owp=owp, cp=cp)
    return pl.pallas_call(
        kernel,
        out_shape=jax.ShapeDtypeStruct((n, oh, ow, cp), jnp.float32),
        grid_spec=pltpu.PrefetchScalarGridSpec(
            num_scalar_prefetch=0,
            grid=(n,),
            in_specs=[pl.BlockSpec((None, oh, ow, cp), lambda b: (b, 0, 0, 0)),
                      pl.BlockSpec((2, cp), lambda b: (0, 0)),
                      pl.BlockSpec((9, cp, cp), lambda b: (0, 0, 0)),
                      pl.BlockSpec((None, oh, ow, cp), lambda b: (b, 0, 0, 0))],
            out_specs=pl.BlockSpec((None, oh, ow, cp), lambda b: (b, 0, 0, 0)),
            scratch_shapes=[pltpu.VMEM((ohp, owp, cp), jnp.bfloat16)]),
        compiler_params=pltpu.CompilerParams(
            dimension_semantics=("parallel",),
            vmem_limit_bytes=vmem_limit),
    )(y2, aff2, w3p, x1)


# ---------------------------------------------------------------------------
# Plain-JAX glue: conv1 im2col, weight packing, BN stat folding
# ---------------------------------------------------------------------------
def _im2col(x_nhwc, kh, kw, stride, pad):
    n, h, w, c = x_nhwc.shape
    xp = jnp.pad(x_nhwc, ((0, 0), (pad, pad), (pad, pad), (0, 0)))
    oh = (h + 2 * pad - kh) // stride + 1
    ow = (w + 2 * pad - kw) // stride + 1
    cols = []
    for i in range(kh):
        for j in range(kw):
            cols.append(xp[:, i:i + stride * oh:stride, j:j + stride * ow:stride, :])
    patches = jnp.stack(cols, axis=3)                 # (n, oh, ow, kh*kw, c)
    return patches.reshape(n * oh * ow, kh * kw * c), oh, ow


def _pack_w_conv1(w_oihw, cp):
    # (Cout, Cin, KH, KW) -> (KH*KW*Cin, Cout padded to cp), K order (kh, kw, cin)
    cout = w_oihw.shape[0]
    w = jnp.transpose(w_oihw, (2, 3, 1, 0)).reshape(-1, cout)
    return jnp.pad(w, ((0, 0), (0, cp - cout))).astype(jnp.bfloat16)


def _pack_w_3x3(w_oihw, cp):
    # (Cout, Cin, 3, 3) -> (9, Cin padded, Cout padded); [k, ci, co] = w[co, ci, di, dj]
    cout, cin, kh, kw = w_oihw.shape
    w = jnp.transpose(w_oihw, (2, 3, 1, 0)).reshape(kh * kw, cin, cout)
    return jnp.pad(w, ((0, 0), (0, cp - cin), (0, cp - cout))).astype(jnp.bfloat16)


def _fold_bn(sums, gamma, beta, count, cp):
    c = gamma.shape[0]
    g = jnp.pad(gamma.reshape(1, c).astype(jnp.float32), ((0, 0), (0, cp - c)))
    b = jnp.pad(beta.reshape(1, c).astype(jnp.float32), ((0, 0), (0, cp - c)))
    mean = sums[0:1, :] / count
    var = jnp.maximum(sums[1:2, :] / count - mean * mean, 0.0)
    scale = g * lax.rsqrt(var + EPS)
    shift = b - mean * scale
    return jnp.concatenate([scale, shift], axis=0)    # (2, cp) f32


# ---------------------------------------------------------------------------
# Block forward (NCHW in / NCHW out, equivalent to PyTorch Block.forward)
# ---------------------------------------------------------------------------
def block_forward(x_nchw, params):
    x = jnp.transpose(x_nchw, (0, 2, 3, 1)).astype(jnp.float32)   # -> NHWC
    n = x.shape[0]
    c = params["w1"].shape[0]                 # dimension // 2
    cp = _round_up(c, LANE)                   # lane-dense channel padding
    tm_max, vmem_limit = _chip_tuning()

    # ---- conv1 (k=4, s=4, p=1) + BN1 statistics ---------------------------
    p1, oh, ow = _im2col(x, 4, 4, 4, 1)       # stride == kernel: ~no duplication
    m = n * oh * ow                           # real row count for BN stats
    tm, grid_m = _pick_tm(m, tm_max)
    m_pad = tm * grid_m
    # Zero-padded rows contribute nothing to the conv output or the BN sums.
    p1 = jnp.pad(p1, ((0, m_pad - m), (0, 0))).astype(jnp.bfloat16)
    y1_2d, s1 = _conv1_pass(p1, _pack_w_conv1(params["w1"], cp), tm, grid_m,
                            vmem_limit)
    aff1 = _fold_bn(s1, params["g1"], params["b1"], m, cp)
    y1 = y1_2d[:m].reshape(n, oh, ow, cp)

    # ---- BN1 affine + LReLU + conv2 (shifted matmuls) + BN2 stats ---------
    x1, y2, s2 = _conv2_pass(y1, aff1, _pack_w_3x3(params["w2"], cp), vmem_limit)
    aff2 = _fold_bn(jnp.sum(s2, axis=0), params["g2"], params["b2"], m, cp)

    # ---- BN2 affine + LReLU + conv3 + residual + LReLU --------------------
    out = _conv3_pass(y2, aff2, _pack_w_3x3(params["w3"], cp), x1, vmem_limit)
    return jnp.transpose(out[:, :, :, :c], (0, 3, 1, 2))          # back to NCHW


# ---------------------------------------------------------------------------
# Pure-JAX reference (same math, bf16 conv operands / f32 accumulation & BN)
# ---------------------------------------------------------------------------
def _conv_ref(x, w, stride):
    dn = lax.conv_dimension_numbers(x.shape, w.shape, ("NCHW", "OIHW", "NCHW"))
    return lax.conv_general_dilated(
        x.astype(jnp.bfloat16), w.astype(jnp.bfloat16), (stride, stride),
        ((1, 1), (1, 1)), dimension_numbers=dn,
        preferred_element_type=jnp.float32)


def _bn_ref(y, g, b):
    mean = y.mean(axis=(0, 2, 3), keepdims=True)
    var = ((y - mean) ** 2).mean(axis=(0, 2, 3), keepdims=True)
    return ((y - mean) * lax.rsqrt(var + EPS) * g.reshape(1, -1, 1, 1)
            + b.reshape(1, -1, 1, 1))


def block_ref(x, params):
    y = _leaky(_bn_ref(_conv_ref(x, params["w1"], 4), params["g1"], params["b1"]))
    r = y
    y = _leaky(_bn_ref(_conv_ref(y, params["w2"], 1), params["g2"], params["b2"]))
    y = _conv_ref(y, params["w3"], 1)
    return _leaky(y + r)


# ---------------------------------------------------------------------------
if __name__ == "__main__":
    key = jax.random.PRNGKey(0)
    k_x, k_w1, k_w2, k_w3 = jax.random.split(key, 4)

    dimension = 8                     # input channels
    c_half = dimension // 2
    N, H, W = 2, 16, 16               # small synthetic shapes

    x = jax.random.normal(k_x, (N, dimension, H, W), dtype=jnp.float32)

    params = {
        # conv weights in PyTorch layout (Cout, Cin, KH, KW)
        "w1": 0.05 * jax.random.normal(k_w1, (c_half, dimension, 4, 4), jnp.float32),
        "w2": 0.05 * jax.random.normal(k_w2, (c_half, c_half, 3, 3), jnp.float32),
        "w3": 0.05 * jax.random.normal(k_w3, (c_half, c_half, 3, 3), jnp.float32),
        # BatchNorm affine params, PyTorch default init (weight=1, bias=0)
        "g1": jnp.ones((c_half,), jnp.float32),
        "b1": jnp.zeros((c_half,), jnp.float32),
        "g2": jnp.ones((c_half,), jnp.float32),
        "b2": jnp.zeros((c_half,), jnp.float32),
    }

    out = jax.block_until_ready(jax.jit(block_forward)(x, params))
    ref = jax.block_until_ready(jax.jit(block_ref)(x, params))

    assert out.shape == (N, c_half, H // 4, W // 4), out.shape
    max_err = float(jnp.max(jnp.abs(out - ref)))
    # bf16 storage of the inter-pass activations (y1, x1, y2) adds ~1e-2 abs
    # error relative to the f32-BN reference at these scales.
    assert jnp.allclose(out, ref, atol=3e-2, rtol=3e-2), max_err

    print("KERNEL_OK")
</pallas_src>

<mosaic_0001>
module attributes {stable_mosaic.version = 11 : i64} {
  func.func @_conv1_stats_kernel(%arg0: i32, %arg1: memref<32x128xbf16, #tpu.memory_space<vmem>>, %arg2: memref<128x128xbf16, #tpu.memory_space<vmem>>, %arg3: memref<32x128xbf16, #tpu.memory_space<vmem>>, %arg4: memref<2x128xf32, #tpu.memory_space<vmem>>) attributes {dimension_semantics = [#tpu.dimension_semantics<arbitrary>], iteration_bounds = array<i64: 1>, scalar_prefetch = 0 : i64, scratch_operands = 0 : i64, tpu.core_type = #tpu.core_type<tc>, window_params = [{transform_indices = @transform_0, window_bounds = array<i64: 32, 128>}, {pipeline_mode = #tpu.pipeline_mode<synchronous>, transform_indices = @transform_1, window_bounds = array<i64: 128, 128>}, {transform_indices = @transform_2, window_bounds = array<i64: 32, 128>}, {pipeline_mode = #tpu.pipeline_mode<synchronous>, transform_indices = @transform_3, window_bounds = array<i64: 2, 128>}]} {
    %c0_i32 = arith.constant 0 : i32
    %0 = arith.cmpi eq, %arg0, %c0_i32 : i32
    %1 = arith.extui %0 : i1 to i32
    %c0_i32_0 = arith.constant 0 : i32
    %2 = arith.cmpi ne, %1, %c0_i32_0 : i32
    scf.if %2 {
      %cst_12 = arith.constant 0.000000e+00 : f32
      %17 = vector.broadcast %cst_12 : f32 to vector<2x128xf32>
      %c0_13 = arith.constant 0 : index
      %c0_14 = arith.constant 0 : index
      %18 = vector.load %arg4[%c0_13, %c0_14] : memref<2x128xf32, #tpu.memory_space<vmem>>, vector<2x128xf32>
      tpu.vector_store %arg4[%c0_13, %c0_14], %17 {strides = array<i32>} : memref<2x128xf32, #tpu.memory_space<vmem>>, vector<2x128xf32>,
    } else {
    }
    %c0 = arith.constant 0 : index
    %c0_1 = arith.constant 0 : index
    %3 = vector.load %arg1[%c0, %c0_1] : memref<32x128xbf16, #tpu.memory_space<vmem>>, vector<32x128xbf16>
    %c0_2 = arith.constant 0 : index
    %c0_3 = arith.constant 0 : index
    %4 = vector.load %arg2[%c0_2, %c0_3] : memref<128x128xbf16, #tpu.memory_space<vmem>>, vector<128x128xbf16>
    %cst = arith.constant dense<0.000000e+00> : vector<32x128xf32>
    %5 = tpu.matmul %3, %4, %cst {dimension_numbers = #tpu.dot_dimension_numbers<[1], [0], [0], [1], [0, 0, 1, 1], [], []>} : vector<32x128xbf16>, vector<128x128xbf16>, vector<32x128xf32> -> vector<32x128xf32>
    %6 = arith.truncf %5 : vector<32x128xf32> to vector<32x128xbf16>
    %c0_4 = arith.constant 0 : index
    %c0_5 = arith.constant 0 : index
    %7 = vector.load %arg3[%c0_4, %c0_5] : memref<32x128xbf16, #tpu.memory_space<vmem>>, vector<32x128xbf16>
    tpu.vector_store %arg3[%c0_4, %c0_5], %6 {strides = array<i32>} : memref<32x128xbf16, #tpu.memory_space<vmem>>, vector<32x128xbf16>,
    %c0_6 = arith.constant 0 : index
    %c0_7 = arith.constant 0 : index
    %8 = vector.load %arg4[%c0_6, %c0_7] : memref<2x128xf32, #tpu.memory_space<vmem>>, vector<2x128xf32>
    %cst_8 = arith.constant dense<0.000000e+00> : vector<128xf32>
    %9 = vector.multi_reduction <add>, %5, %cst_8 [0] : vector<32x128xf32> to vector<128xf32>
    %10 = vector.shape_cast %9 : vector<128xf32> to vector<1x128xf32>
    %11 = arith.mulf %5, %5 : vector<32x128xf32>
    %cst_9 = arith.constant dense<0.000000e+00> : vector<128xf32>
    %12 = vector.multi_reduction <add>, %11, %cst_9 [0] : vector<32x128xf32> to vector<128xf32>
    %13 = vector.shape_cast %12 : vector<128xf32> to vector<1x128xf32>
    %14 = tpu.concatenate %10, %13 in 0 : vector<1x128xf32>, vector<1x128xf32> -> vector<2x128xf32>
    %15 = arith.addf %8, %14 : vector<2x128xf32>
    %c0_10 = arith.constant 0 : index
    %c0_11 = arith.constant 0 : index
    %16 = vector.load %arg4[%c0_10, %c0_11] : memref<2x128xf32, #tpu.memory_space<vmem>>, vector<2x128xf32>
    tpu.vector_store %arg4[%c0_10, %c0_11], %15 {strides = array<i32>} : memref<2x128xf32, #tpu.memory_space<vmem>>, vector<2x128xf32>,
    return
  }
  func.func @transform_0(%arg0: i32) -> (i32, i32) {
    %c0_i32 = arith.constant 0 : i32
    %c0_i32_0 = arith.constant 0 : i32
    return %arg0, %c0_i32 : i32, i32
  }
  func.func @transform_1(%arg0: i32) -> (i32, i32) {
    %c0_i32 = arith.constant 0 : i32
    %c0_i32_0 = arith.constant 0 : i32
    %c0_i32_1 = arith.constant 0 : i32
    return %c0_i32, %c0_i32_0 : i32, i32
  }
  func.func @transform_2(%arg0: i32) -> (i32, i32) {
    %c0_i32 = arith.constant 0 : i32
    %c0_i32_0 = arith.constant 0 : i32
    return %arg0, %c0_i32 : i32, i32
  }
  func.func @transform_3(%arg0: i32) -> (i32, i32) {
    %c0_i32 = arith.constant 0 : i32
    %c0_i32_0 = arith.constant 0 : i32
    %c0_i32_1 = arith.constant 0 : i32
    return %c0_i32, %c0_i32_0 : i32, i32
  }
}

module attributes {stable_mosaic.version = 11 : i64} {
  func.func @_conv2_fused_kernel(%arg0: i32, %arg1: memref<1x4x4x128xbf16, #tpu.memory_space<vmem>>, %arg2: memref<2x128xf32, #tpu.memory_space<vmem>>, %arg3: memref<9x128x128xbf16, #tpu.memory_space<vmem>>, %arg4: memref<1x4x4x128xbf16, #tpu.memory_space<vmem>>, %arg5: memref<1x4x4x128xbf16, #tpu.memory_space<vmem>>, %arg6: memref<1x2x128xf32, #tpu.memory_space<vmem>>, %arg7: memref<6x6x128xbf16, #tpu.memory_space<vmem>>) attributes {dimension_semantics = [#tpu.dimension_semantics<parallel>], iteration_bounds = array<i64: 2>, scalar_prefetch = 0 : i64, scratch_operands = 1 : i64, tpu.core_type = #tpu.core_type<tc>, window_params = [{transform_indices = @transform_0, window_bounds = array<i64: 1, 4, 4, 128>}, {pipeline_mode = #tpu.pipeline_mode<synchronous>, transform_indices = @transform_1, window_bounds = array<i64: 2, 128>}, {pipeline_mode = #tpu.pipeline_mode<synchronous>, transform_indices = @transform_2, window_bounds = array<i64: 9, 128, 128>}, {transform_indices = @transform_3, window_bounds = array<i64: 1, 4, 4, 128>}, {transform_indices = @transform_4, window_bounds = array<i64: 1, 4, 4, 128>}, {transform_indices = @transform_5, window_bounds = array<i64: 1, 2, 128>}]} {
    %c0 = arith.constant 0 : index
    %c0_0 = arith.constant 0 : index
    %0 = vector.load %arg2[%c0, %c0_0] : memref<2x128xf32, #tpu.memory_space<vmem>>, vector<1x128xf32>
    %c1 = arith.constant 1 : index
    %c0_1 = arith.constant 0 : index
    %1 = vector.load %arg2[%c1, %c0_1] : memref<2x128xf32, #tpu.memory_space<vmem>>, vector<1x128xf32>
    %cst = arith.constant 0.000000e+00 : bf16
    %2 = vector.broadcast %cst : bf16 to vector<6x128xbf16>
    %cst_2 = arith.constant 0.000000e+00 : f32
    %3 = vector.broadcast %cst_2 : f32 to vector<1x128xf32>
    %c0_3 = arith.constant 0 : index
    %c0_4 = arith.constant 0 : index
    %c0_5 = arith.constant 0 : index
    %4 = vector.load %arg7[%c0_3, %c0_4, %c0_5] : memref<6x6x128xbf16, #tpu.memory_space<vmem>>, vector<1x6x128xbf16>
    %5 = vector.shape_cast %4 : vector<1x6x128xbf16> to vector<6x128xbf16>
    %6 = vector.shape_cast %2 : vector<6x128xbf16> to vector<1x6x128xbf16>
    tpu.vector_store %arg7[%c0_3, %c0_4, %c0_5], %6 {strides = array<i32>} : memref<6x6x128xbf16, #tpu.memory_space<vmem>>, vector<1x6x128xbf16>,
    %c5 = arith.constant 5 : index
    %c0_6 = arith.constant 0 : index
    %c0_7 = arith.constant 0 : index
    %7 = vector.load %arg7[%c5, %c0_6, %c0_7] : memref<6x6x128xbf16, #tpu.memory_space<vmem>>, vector<1x6x128xbf16>
    %8 = vector.shape_cast %7 : vector<1x6x128xbf16> to vector<6x128xbf16>
    %9 = vector.shape_cast %2 : vector<6x128xbf16> to vector<1x6x128xbf16>
    tpu.vector_store %arg7[%c5, %c0_6, %c0_7], %9 {strides = array<i32>} : memref<6x6x128xbf16, #tpu.memory_space<vmem>>, vector<1x6x128xbf16>,
    %c0_i32 = arith.constant 0 : i32
    %c4_i32 = arith.constant 4 : i32
    %10 = arith.addi %c0_i32, %c4_i32 : i32
    %c1_i32 = arith.constant 1 : i32
    scf.for %arg8 = %c0_i32 to %10 step %c1_i32  : i32 {
      %c0_17 = arith.constant 0 : index
      %17 = arith.index_cast %arg8 : i32 to index
      %c0_18 = arith.constant 0 : index
      %c0_19 = arith.constant 0 : index
      %18 = vector.load %arg1[%c0_17, %17, %c0_18, %c0_19] : memref<1x4x4x128xbf16, #tpu.memory_space<vmem>>, vector<1x1x4x128xbf16>
      %19 = vector.shape_cast %18 : vector<1x1x4x128xbf16> to vector<4x128xbf16>
      %20 = arith.extf %19 : vector<4x128xbf16> to vector<4x128xf32>
      %21 = vector.broadcast %0 : vector<1x128xf32> to vector<4x128xf32>
      %22 = arith.mulf %20, %21 : vector<4x128xf32>
      %23 = vector.broadcast %1 : vector<1x128xf32> to vector<4x128xf32>
      %24 = arith.addf %22, %23 : vector<4x128xf32>
      %cst_20 = arith.constant 0.000000e+00 : f32
      %25 = vector.broadcast %cst_20 : f32 to vector<4x128xf32>
      %26 = arith.cmpf ogt, %24, %25 : vector<4x128xf32>
      %cst_21 = arith.constant 2.000000e-01 : f32
      %27 = vector.broadcast %cst_21 : f32 to vector<4x128xf32>
      %28 = arith.mulf %27, %24 : vector<4x128xf32>
      %29 = arith.select %26, %24, %28 : vector<4x128xi1>, vector<4x128xf32>
      %30 = arith.truncf %29 : vector<4x128xf32> to vector<4x128xbf16>
      %c0_22 = arith.constant 0 : index
      %31 = arith.index_cast %arg8 : i32 to index
      %c0_23 = arith.constant 0 : index
      %c0_24 = arith.constant 0 : index
      %32 = vector.load %arg4[%c0_22, %31, %c0_23, %c0_24] : memref<1x4x4x128xbf16, #tpu.memory_space<vmem>>, vector<1x1x4x128xbf16>
      %33 = vector.shape_cast %32 : vector<1x1x4x128xbf16> to vector<4x128xbf16>
      %34 = vector.shape_cast %30 : vector<4x128xbf16> to vector<1x1x4x128xbf16>
      tpu.vector_store %arg4[%c0_22, %31, %c0_23, %c0_24], %34 {strides = array<i32>} : memref<1x4x4x128xbf16, #tpu.memory_space<vmem>>, vector<1x1x4x128xbf16>,
      %35 = tpu.concatenate %3, %29, %3 in 0 : vector<1x128xf32>, vector<4x128xf32>, vector<1x128xf32> -> vector<6x128xf32>
      %36 = arith.truncf %35 : vector<6x128xf32> to vector<6x128xbf16>
      %c1_i32_25 = arith.constant 1 : i32
      %37 = arith.addi %arg8, %c1_i32_25 : i32
      %38 = arith.index_cast %37 : i32 to index
      %c0_26 = arith.constant 0 : index
      %c0_27 = arith.constant 0 : index
      %39 = vector.load %arg7[%38, %c0_26, %c0_27] : memref<6x6x128xbf16, #tpu.memory_space<vmem>>, vector<1x6x128xbf16>
      %40 = vector.shape_cast %39 : vector<1x6x128xbf16> to vector<6x128xbf16>
      %41 = vector.shape_cast %36 : vector<6x128xbf16> to vector<1x6x128xbf16>
      tpu.vector_store %arg7[%38, %c0_26, %c0_27], %41 {strides = array<i32>} : memref<6x6x128xbf16, #tpu.memory_space<vmem>>, vector<1x6x128xbf16>,
    }
    %c4_i32_8 = arith.constant 4 : i32
    %cst_9 = arith.constant 0.000000e+00 : f32
    %11 = vector.broadcast %cst_9 : f32 to vector<2x128xf32>
    %c0_i32_10 = arith.constant 0 : i32
    %c4_i32_11 = arith.constant 4 : i32
    %12 = arith.addi %c0_i32_10, %c4_i32_11 : i32
    %c1_i32_12 = arith.constant 1 : i32
    %13 = scf.for %arg8 = %c0_i32_10 to %12 step %c1_i32_12 iter_args(%arg9 = %11) -> (vector<2x128xf32>)  : i32 {
      %cst_17 = arith.constant 0.000000e+00 : f32
      %17 = vector.broadcast %cst_17 : f32 to vector<4x128xf32>
      %c0_i32_18 = arith.constant 0 : i32
      %18 = arith.addi %arg8, %c0_i32_18 : i32
      %19 = arith.index_cast %18 : i32 to index
      %c0_19 = arith.constant 0 : index
      %c0_20 = arith.constant 0 : index
      %20 = vector.load %arg7[%19, %c0_19, %c0_20] : memref<6x6x128xbf16, #tpu.memory_space<vmem>>, vector<1x6x128xbf16>
      %21 = vector.shape_cast %20 : vector<1x6x128xbf16> to vector<6x128xbf16>
      %22 = vector.extract_strided_slice %21 {offsets = [0, 0], sizes = [4, 128], strides = [1, 1]} : vector<6x128xbf16> to vector<4x128xbf16>
      %c0_21 = arith.constant 0 : index
      %c0_22 = arith.constant 0 : index
      %c0_23 = arith.constant 0 : index
      %23 = vector.load %arg3[%c0_21, %c0_22, %c0_23] : memref<9x128x128xbf16, #tpu.memory_space<vmem>>, vector<1x128x128xbf16>
      %24 = vector.shape_cast %23 : vector<1x128x128xbf16> to vector<128x128xbf16>
      %cst_24 = arith.constant dense<0.000000e+00> : vector<4x128xf32>
      %25 = tpu.matmul %22, %24, %cst_24 {dimension_numbers = #tpu.dot_dimension_numbers<[1], [0], [0], [1], [0, 0, 1, 1], [], []>} : vector<4x128xbf16>, vector<128x128xbf16>, vector<4x128xf32> -> vector<4x128xf32>
      %26 = arith.addf %17, %25 : vector<4x128xf32>
      %27 = vector.extract_strided_slice %21 {offsets = [1, 0], sizes = [4, 128], strides = [1, 1]} : vector<6x128xbf16> to vector<4x128xbf16>
      %c1_25 = arith.constant 1 : index
      %c0_26 = arith.constant 0 : index
      %c0_27 = arith.constant 0 : index
      %28 = vector.load %arg3[%c1_25, %c0_26, %c0_27] : memref<9x128x128xbf16, #tpu.memory_space<vmem>>, vector<1x128x128xbf16>
      %29 = vector.shape_cast %28 : vector<1x128x128xbf16> to vector<128x128xbf16>
      %cst_28 = arith.constant dense<0.000000e+00> : vector<4x128xf32>
      %30 = tpu.matmul %27, %29, %cst_28 {dimension_numbers = #tpu.dot_dimension_numbers<[1], [0], [0], [1], [0, 0, 1, 1], [], []>} : vector<4x128xbf16>, vector<128x128xbf16>, vector<4x128xf32> -> vector<4x128xf32>
      %31 = arith.addf %26, %30 : vector<4x128xf32>
      %32 = vector.extract_strided_slice %21 {offsets = [2, 0], sizes = [4, 128], strides = [1, 1]} : vector<6x128xbf16> to vector<4x128xbf16>
      %c2 = arith.constant 2 : index
      %c0_29 = arith.constant 0 : index
      %c0_30 = arith.constant 0 : index
      %33 = vector.load %arg3[%c2, %c0_29, %c0_30] : memref<9x128x128xbf16, #tpu.memory_space<vmem>>, vector<1x128x128xbf16>
      %34 = vector.shape_cast %33 : vector<1x128x128xbf16> to vector<128x128xbf16>
      %cst_31 = arith.constant dense<0.000000e+00> : vector<4x128xf32>
      %35 = tpu.matmul %32, %34, %cst_31 {dimension_numbers = #tpu.dot_dimension_numbers<[1], [0], [0], [1], [0, 0, 1, 1], [], []>} : vector<4x128xbf16>, vector<128x128xbf16>, vector<4x128xf32> -> vector<4x128xf32>
      %36 = arith.addf %31, %35 : vector<4x128xf32>
      %c1_i32_32 = arith.constant 1 : i32
      %37 = arith.addi %arg8, %c1_i32_32 : i32
      %38 = arith.index_cast %37 : i32 to index
      %c0_33 = arith.constant 0 : index
      %c0_34 = arith.constant 0 : index
      %39 = vector.load %arg7[%38, %c0_33, %c0_34] : memref<6x6x128xbf16, #tpu.memory_space<vmem>>, vector<1x6x128xbf16>
      %40 = vector.shape_cast %39 : vector<1x6x128xbf16> to vector<6x128xbf16>
      %41 = vector.extract_strided_slice %40 {offsets = [0, 0], sizes = [4, 128], strides = [1, 1]} : vector<6x128xbf16> to vector<4x128xbf16>
      %c3 = arith.constant 3 : index
      %c0_35 = arith.constant 0 : index
      %c0_36 = arith.constant 0 : index
      %42 = vector.load %arg3[%c3, %c0_35, %c0_36] : memref<9x128x128xbf16, #tpu.memory_space<vmem>>, vector<1x128x128xbf16>
      %43 = vector.shape_cast %42 : vector<1x128x128xbf16> to vector<128x128xbf16>
      %cst_37 = arith.constant dense<0.000000e+00> : vector<4x128xf32>
      %44 = tpu.matmul %41, %43, %cst_37 {dimension_numbers = #tpu.dot_dimension_numbers<[1], [0], [0], [1], [0, 0, 1, 1], [], []>} : vector<4x128xbf16>, vector<128x128xbf16>, vector<4x128xf32> -> vector<4x128xf32>
      %45 = arith.addf %36, %44 : vector<4x128xf32>
      %46 = vector.extract_strided_slice %40 {offsets = [1, 0], sizes = [4, 128], strides = [1, 1]} : vector<6x128xbf16> to vector<4x128xbf16>
      %c4 = arith.constant 4 : index
      %c0_38 = arith.constant 0 : index
      %c0_39 = arith.constant 0 : index
      %47 = vector.load %arg3[%c4, %c0_38, %c0_39] : memref<9x128x128xbf16, #tpu.memory_space<vmem>>, vector<1x128x128xbf16>
      %48 = vector.shape_cast %47 : vector<1x128x128xbf16> to vector<128x128xbf16>
      %cst_40 = arith.constant dense<0.000000e+00> : vector<4x128xf32>
      %49 = tpu.matmul %46, %48, %cst_40 {dimension_numbers = #tpu.dot_dimension_numbers<[1], [0], [0], [1], [0, 0, 1, 1], [], []>} : vector<4x128xbf16>, vector<128x128xbf16>, vector<4x128xf32> -> vector<4x128xf32>
      %50 = arith.addf %45, %49 : vector<4x128xf32>
      %51 = vector.extract_strided_slice %40 {offsets = [2, 0], sizes = [4, 128], strides = [1, 1]} : vector<6x128xbf16> to vector<4x128xbf16>
      %c5_41 = arith.constant 5 : index
      %c0_42 = arith.constant 0 : index
      %c0_43 = arith.constant 0 : index
      %52 = vector.load %arg3[%c5_41, %c0_42, %c0_43] : memref<9x128x128xbf16, #tpu.memory_space<vmem>>, vector<1x128x128xbf16>
      %53 = vector.shape_cast %52 : vector<1x128x128xbf16> to vector<128x128xbf16>
      %cst_44 = arith.constant dense<0.000000e+00> : vector<4x128xf32>
      %54 = tpu.matmul %51, %53, %cst_44 {dimension_numbers = #tpu.dot_dimension_numbers<[1], [0], [0], [1], [0, 0, 1, 1], [], []>} : vector<4x128xbf16>, vector<128x128xbf16>, vector<4x128xf32> -> vector<4x128xf32>
      %55 = arith.addf %50, %54 : vector<4x128xf32>
      %c2_i32 = arith.constant 2 : i32
      %56 = arith.addi %arg8, %c2_i32 : i32
      %57 = arith.index_cast %56 : i32 to index
      %c0_45 = arith.constant 0 : index
      %c0_46 = arith.constant 0 : index
      %58 = vector.load %arg7[%57, %c0_45, %c0_46] : memref<6x6x128xbf16, #tpu.memory_space<vmem>>, vector<1x6x128xbf16>
      %59 = vector.shape_cast %58 : vector<1x6x128xbf16> to vector<6x128xbf16>
      %60 = vector.extract_strided_slice %59 {offsets = [0, 0], sizes = [4, 128], strides = [1, 1]} : vector<6x128xbf16> to vector<4x128xbf16>
      %c6 = arith.constant 6 : index
      %c0_47 = arith.constant 0 : index
      %c0_48 = arith.constant 0 : index
      %61 = vector.load %arg3[%c6, %c0_47, %c0_48] : memref<9x128x128xbf16, #tpu.memory_space<vmem>>, vector<1x128x128xbf16>
      %62 = vector.shape_cast %61 : vector<1x128x128xbf16> to vector<128x128xbf16>
      %cst_49 = arith.constant dense<0.000000e+00> : vector<4x128xf32>
      %63 = tpu.matmul %60, %62, %cst_49 {dimension_numbers = #tpu.dot_dimension_numbers<[1], [0], [0], [1], [0, 0, 1, 1], [], []>} : vector<4x128xbf16>, vector<128x128xbf16>, vector<4x128xf32> -> vector<4x128xf32>
      %64 = arith.addf %55, %63 : vector<4x128xf32>
      %65 = vector.extract_strided_slice %59 {offsets = [1, 0], sizes = [4, 128], strides = [1, 1]} : vector<6x128xbf16> to vector<4x128xbf16>
      %c7 = arith.constant 7 : index
      %c0_50 = arith.constant 0 : index
      %c0_51 = arith.constant 0 : index
      %66 = vector.load %arg3[%c7, %c0_50, %c0_51] : memref<9x128x128xbf16, #tpu.memory_space<vmem>>, vector<1x128x128xbf16>
      %67 = vector.shape_cast %66 : vector<1x128x128xbf16> to vector<128x128xbf16>
      %cst_52 = arith.constant dense<0.000000e+00> : vector<4x128xf32>
      %68 = tpu.matmul %65, %67, %cst_52 {dimension_numbers = #tpu.dot_dimension_numbers<[1], [0], [0], [1], [0, 0, 1, 1], [], []>} : vector<4x128xbf16>, vector<128x128xbf16>, vector<4x128xf32> -> vector<4x128xf32>
      %69 = arith.addf %64, %68 : vector<4x128xf32>
      %70 = vector.extract_strided_slice %59 {offsets = [2, 0], sizes = [4, 128], strides = [1, 1]} : vector<6x128xbf16> to vector<4x128xbf16>
      %c8 = arith.constant 8 : index
      %c0_53 = arith.constant 0 : index
      %c0_54 = arith.constant 0 : index
      %71 = vector.load %arg3[%c8, %c0_53, %c0_54] : memref<9x128x128xbf16, #tpu.memory_space<vmem>>, vector<1x128x128xbf16>
      %72 = vector.shape_cast %71 : vector<1x128x128xbf16> to vector<128x128xbf16>
      %cst_55 = arith.constant dense<0.000000e+00> : vector<4x128xf32>
      %73 = tpu.matmul %70, %72, %cst_55 {dimension_numbers = #tpu.dot_dimension_numbers<[1], [0], [0], [1], [0, 0, 1, 1], [], []>} : vector<4x128xbf16>, vector<128x128xbf16>, vector<4x128xf32> -> vector<4x128xf32>
      %74 = arith.addf %69, %73 : vector<4x128xf32>
      %75 = arith.truncf %74 : vector<4x128xf32> to vector<4x128xbf16>
      %c0_56 = arith.constant 0 : index
      %76 = arith.index_cast %arg8 : i32 to index
      %c0_57 = arith.constant 0 : index
      %c0_58 = arith.constant 0 : index
      %77 = vector.load %arg5[%c0_56, %76, %c0_57, %c0_58] : memref<1x4x4x128xbf16, #tpu.memory_space<vmem>>, vector<1x1x4x128xbf16>
      %78 = vector.shape_cast %77 : vector<1x1x4x128xbf16> to vector<4x128xbf16>
      %79 = vector.shape_cast %75 : vector<4x128xbf16> to vector<1x1x4x128xbf16>
      tpu.vector_store %arg5[%c0_56, %76, %c0_57, %c0_58], %79 {strides = array<i32>} : memref<1x4x4x128xbf16, #tpu.memory_space<vmem>>, vector<1x1x4x128xbf16>,
      %cst_59 = arith.constant dense<0.000000e+00> : vector<128xf32>
      %80 = vector.multi_reduction <add>, %74, %cst_59 [0] : vector<4x128xf32> to vector<128xf32>
      %81 = vector.shape_cast %80 : vector<128xf32> to vector<1x128xf32>
      %82 = arith.mulf %74, %74 : vector<4x128xf32>
      %cst_60 = arith.constant dense<0.000000e+00> : vector<128xf32>
      %83 = vector.multi_reduction <add>, %82, %cst_60 [0] : vector<4x128xf32> to vector<128xf32>
      %84 = vector.shape_cast %83 : vector<128xf32> to vector<1x128xf32>
      %85 = tpu.concatenate %81, %84 in 0 : vector<1x128xf32>, vector<1x128xf32> -> vector<2x128xf32>
      %86 = arith.addf %arg9, %85 : vector<2x128xf32>
      scf.yield %86 : vector<2x128xf32>
    }
    %c4_i32_13 = arith.constant 4 : i32
    %c0_14 = arith.constant 0 : index
    %c0_15 = arith.constant 0 : index
    %c0_16 = arith.constant 0 : index
    %14 = vector.load %arg6[%c0_14, %c0_15, %c0_16] : memref<1x2x128xf32, #tpu.memory_space<vmem>>, vector<1x2x128xf32>
    %15 = vector.shape_cast %14 : vector<1x2x128xf32> to vector<2x128xf32>
    %16 = vector.shape_cast %13 : vector<2x128xf32> to vector<1x2x128xf32>
    tpu.vector_store %arg6[%c0_14, %c0_15, %c0_16], %16 {strides = array<i32>} : memref<1x2x128xf32, #tpu.memory_space<vmem>>, vector<1x2x128xf32>,
    return
  }
  func.func @transform_0(%arg0: i32) -> (i32, i32, i32, i32) {
    %c0_i32 = arith.constant 0 : i32
    %c0_i32_0 = arith.constant 0 : i32
    %c0_i32_1 = arith.constant 0 : i32
    %c0_i32_2 = arith.constant 0 : i32
    return %arg0, %c0_i32, %c0_i32_0, %c0_i32_1 : i32, i32, i32, i32
  }
  func.func @transform_1(%arg0: i32) -> (i32, i32) {
    %c0_i32 = arith.constant 0 : i32
    %c0_i32_0 = arith.constant 0 : i32
    %c0_i32_1 = arith.constant 0 : i32
    return %c0_i32, %c0_i32_0 : i32, i32
  }
  func.func @transform_2(%arg0: i32) -> (i32, i32, i32) {
    %c0_i32 = arith.constant 0 : i32
    %c0_i32_0 = arith.constant 0 : i32
    %c0_i32_1 = arith.constant 0 : i32
    %c0_i32_2 = arith.constant 0 : i32
    return %c0_i32, %c0_i32_0, %c0_i32_1 : i32, i32, i32
  }
  func.func @transform_3(%arg0: i32) -> (i32, i32, i32, i32) {
    %c0_i32 = arith.constant 0 : i32
    %c0_i32_0 = arith.constant 0 : i32
    %c0_i32_1 = arith.constant 0 : i32
    %c0_i32_2 = arith.constant 0 : i32
    return %arg0, %c0_i32, %c0_i32_0, %c0_i32_1 : i32, i32, i32, i32
  }
  func.func @transform_4(%arg0: i32) -> (i32, i32, i32, i32) {
    %c0_i32 = arith.constant 0 : i32
    %c0_i32_0 = arith.constant 0 : i32
    %c0_i32_1 = arith.constant 0 : i32
    %c0_i32_2 = arith.constant 0 : i32
    return %arg0, %c0_i32, %c0_i32_0, %c0_i32_1 : i32, i32, i32, i32
  }
  func.func @transform_5(%arg0: i32) -> (i32, i32, i32) {
    %c0_i32 = arith.constant 0 : i32
    %c0_i32_0 = arith.constant 0 : i32
    %c0_i32_1 = arith.constant 0 : i32
    return %arg0, %c0_i32, %c0_i32_0 : i32, i32, i32
  }
}

module attributes {stable_mosaic.version = 11 : i64} {
  func.func @_conv3_fused_kernel(%arg0: i32, %arg1: memref<1x4x4x128xbf16, #tpu.memory_space<vmem>>, %arg2: memref<2x128xf32, #tpu.memory_space<vmem>>, %arg3: memref<9x128x128xbf16, #tpu.memory_space<vmem>>, %arg4: memref<1x4x4x128xbf16, #tpu.memory_space<vmem>>, %arg5: memref<1x4x4x128xf32, #tpu.memory_space<vmem>>, %arg6: memref<6x6x128xbf16, #tpu.memory_space<vmem>>) attributes {dimension_semantics = [#tpu.dimension_semantics<parallel>], iteration_bounds = array<i64: 2>, scalar_prefetch = 0 : i64, scratch_operands = 1 : i64, tpu.core_type = #tpu.core_type<tc>, window_params = [{transform_indices = @transform_0, window_bounds = array<i64: 1, 4, 4, 128>}, {pipeline_mode = #tpu.pipeline_mode<synchronous>, transform_indices = @transform_1, window_bounds = array<i64: 2, 128>}, {pipeline_mode = #tpu.pipeline_mode<synchronous>, transform_indices = @transform_2, window_bounds = array<i64: 9, 128, 128>}, {transform_indices = @transform_3, window_bounds = array<i64: 1, 4, 4, 128>}, {transform_indices = @transform_4, window_bounds = array<i64: 1, 4, 4, 128>}]} {
    %c0 = arith.constant 0 : index
    %c0_0 = arith.constant 0 : index
    %0 = vector.load %arg2[%c0, %c0_0] : memref<2x128xf32, #tpu.memory_space<vmem>>, vector<1x128xf32>
    %c1 = arith.constant 1 : index
    %c0_1 = arith.constant 0 : index
    %1 = vector.load %arg2[%c1, %c0_1] : memref<2x128xf32, #tpu.memory_space<vmem>>, vector<1x128xf32>
    %cst = arith.constant 0.000000e+00 : bf16
    %2 = vector.broadcast %cst : bf16 to vector<6x128xbf16>
    %cst_2 = arith.constant 0.000000e+00 : f32
    %3 = vector.broadcast %cst_2 : f32 to vector<1x128xf32>
    %c0_3 = arith.constant 0 : index
    %c0_4 = arith.constant 0 : index
    %c0_5 = arith.constant 0 : index
    %4 = vector.load %arg6[%c0_3, %c0_4, %c0_5] : memref<6x6x128xbf16, #tpu.memory_space<vmem>>, vector<1x6x128xbf16>
    %5 = vector.shape_cast %4 : vector<1x6x128xbf16> to vector<6x128xbf16>
    %6 = vector.shape_cast %2 : vector<6x128xbf16> to vector<1x6x128xbf16>
    tpu.vector_store %arg6[%c0_3, %c0_4, %c0_5], %6 {strides = array<i32>} : memref<6x6x128xbf16, #tpu.memory_space<vmem>>, vector<1x6x128xbf16>,
    %c5 = arith.constant 5 : index
    %c0_6 = arith.constant 0 : index
    %c0_7 = arith.constant 0 : index
    %7 = vector.load %arg6[%c5, %c0_6, %c0_7] : memref<6x6x128xbf16, #tpu.memory_space<vmem>>, vector<1x6x128xbf16>
    %8 = vector.shape_cast %7 : vector<1x6x128xbf16> to vector<6x128xbf16>
    %9 = vector.shape_cast %2 : vector<6x128xbf16> to vector<1x6x128xbf16>
    tpu.vector_store %arg6[%c5, %c0_6, %c0_7], %9 {strides = array<i32>} : memref<6x6x128xbf16, #tpu.memory_space<vmem>>, vector<1x6x128xbf16>,
    %c0_i32 = arith.constant 0 : i32
    %c4_i32 = arith.constant 4 : i32
    %10 = arith.addi %c0_i32, %c4_i32 : i32
    %c1_i32 = arith.constant 1 : i32
    scf.for %arg7 = %c0_i32 to %10 step %c1_i32  : i32 {
      %c0_13 = arith.constant 0 : index
      %12 = arith.index_cast %arg7 : i32 to index
      %c0_14 = arith.constant 0 : index
      %c0_15 = arith.constant 0 : index
      %13 = vector.load %arg1[%c0_13, %12, %c0_14, %c0_15] : memref<1x4x4x128xbf16, #tpu.memory_space<vmem>>, vector<1x1x4x128xbf16>
      %14 = vector.shape_cast %13 : vector<1x1x4x128xbf16> to vector<4x128xbf16>
      %15 = arith.extf %14 : vector<4x128xbf16> to vector<4x128xf32>
      %16 = vector.broadcast %0 : vector<1x128xf32> to vector<4x128xf32>
      %17 = arith.mulf %15, %16 : vector<4x128xf32>
      %18 = vector.broadcast %1 : vector<1x128xf32> to vector<4x128xf32>
      %19 = arith.addf %17, %18 : vector<4x128xf32>
      %cst_16 = arith.constant 0.000000e+00 : f32
      %20 = vector.broadcast %cst_16 : f32 to vector<4x128xf32>
      %21 = arith.cmpf ogt, %19, %20 : vector<4x128xf32>
      %cst_17 = arith.constant 2.000000e-01 : f32
      %22 = vector.broadcast %cst_17 : f32 to vector<4x128xf32>
      %23 = arith.mulf %22, %19 : vector<4x128xf32>
      %24 = arith.select %21, %19, %23 : vector<4x128xi1>, vector<4x128xf32>
      %25 = tpu.concatenate %3, %24, %3 in 0 : vector<1x128xf32>, vector<4x128xf32>, vector<1x128xf32> -> vector<6x128xf32>
      %26 = arith.truncf %25 : vector<6x128xf32> to vector<6x128xbf16>
      %c1_i32_18 = arith.constant 1 : i32
      %27 = arith.addi %arg7, %c1_i32_18 : i32
      %28 = arith.index_cast %27 : i32 to index
      %c0_19 = arith.constant 0 : index
      %c0_20 = arith.constant 0 : index
      %29 = vector.load %arg6[%28, %c0_19, %c0_20] : memref<6x6x128xbf16, #tpu.memory_space<vmem>>, vector<1x6x128xbf16>
      %30 = vector.shape_cast %29 : vector<1x6x128xbf16> to vector<6x128xbf16>
      %31 = vector.shape_cast %26 : vector<6x128xbf16> to vector<1x6x128xbf16>
      tpu.vector_store %arg6[%28, %c0_19, %c0_20], %31 {strides = array<i32>} : memref<6x6x128xbf16, #tpu.memory_space<vmem>>, vector<1x6x128xbf16>,
    }
    %c4_i32_8 = arith.constant 4 : i32
    %c0_i32_9 = arith.constant 0 : i32
    %c4_i32_10 = arith.constant 4 : i32
    %11 = arith.addi %c0_i32_9, %c4_i32_10 : i32
    %c1_i32_11 = arith.constant 1 : i32
    scf.for %arg7 = %c0_i32_9 to %11 step %c1_i32_11  : i32 {
      %cst_13 = arith.constant 0.000000e+00 : f32
      %12 = vector.broadcast %cst_13 : f32 to vector<4x128xf32>
      %c0_i32_14 = arith.constant 0 : i32
      %13 = arith.addi %arg7, %c0_i32_14 : i32
      %14 = arith.index_cast %13 : i32 to index
      %c0_15 = arith.constant 0 : index
      %c0_16 = arith.constant 0 : index
      %15 = vector.load %arg6[%14, %c0_15, %c0_16] : memref<6x6x128xbf16, #tpu.memory_space<vmem>>, vector<1x6x128xbf16>
      %16 = vector.shape_cast %15 : vector<1x6x128xbf16> to vector<6x128xbf16>
      %17 = vector.extract_strided_slice %16 {offsets = [0, 0], sizes = [4, 128], strides = [1, 1]} : vector<6x128xbf16> to vector<4x128xbf16>
      %c0_17 = arith.constant 0 : index
      %c0_18 = arith.constant 0 : index
      %c0_19 = arith.constant 0 : index
      %18 = vector.load %arg3[%c0_17, %c0_18, %c0_19] : memref<9x128x128xbf16, #tpu.memory_space<vmem>>, vector<1x128x128xbf16>
      %19 = vector.shape_cast %18 : vector<1x128x128xbf16> to vector<128x128xbf16>
      %cst_20 = arith.constant dense<0.000000e+00> : vector<4x128xf32>
      %20 = tpu.matmul %17, %19, %cst_20 {dimension_numbers = #tpu.dot_dimension_numbers<[1], [0], [0], [1], [0, 0, 1, 1], [], []>} : vector<4x128xbf16>, vector<128x128xbf16>, vector<4x128xf32> -> vector<4x128xf32>
      %21 = arith.addf %12, %20 : vector<4x128xf32>
      %22 = vector.extract_strided_slice %16 {offsets = [1, 0], sizes = [4, 128], strides = [1, 1]} : vector<6x128xbf16> to vector<4x128xbf16>
      %c1_21 = arith.constant 1 : index
      %c0_22 = arith.constant 0 : index
      %c0_23 = arith.constant 0 : index
      %23 = vector.load %arg3[%c1_21, %c0_22, %c0_23] : memref<9x128x128xbf16, #tpu.memory_space<vmem>>, vector<1x128x128xbf16>
      %24 = vector.shape_cast %23 : vector<1x128x128xbf16> to vector<128x128xbf16>
      %cst_24 = arith.constant dense<0.000000e+00> : vector<4x128xf32>
      %25 = tpu.matmul %22, %24, %cst_24 {dimension_numbers = #tpu.dot_dimension_numbers<[1], [0], [0], [1], [0, 0, 1, 1], [], []>} : vector<4x128xbf16>, vector<128x128xbf16>, vector<4x128xf32> -> vector<4x128xf32>
      %26 = arith.addf %21, %25 : vector<4x128xf32>
      %27 = vector.extract_strided_slice %16 {offsets = [2, 0], sizes = [4, 128], strides = [1, 1]} : vector<6x128xbf16> to vector<4x128xbf16>
      %c2 = arith.constant 2 : index
      %c0_25 = arith.constant 0 : index
      %c0_26 = arith.constant 0 : index
      %28 = vector.load %arg3[%c2, %c0_25, %c0_26] : memref<9x128x128xbf16, #tpu.memory_space<vmem>>, vector<1x128x128xbf16>
      %29 = vector.shape_cast %28 : vector<1x128x128xbf16> to vector<128x128xbf16>
      %cst_27 = arith.constant dense<0.000000e+00> : vector<4x128xf32>
      %30 = tpu.matmul %27, %29, %cst_27 {dimension_numbers = #tpu.dot_dimension_numbers<[1], [0], [0], [1], [0, 0, 1, 1], [], []>} : vector<4x128xbf16>, vector<128x128xbf16>, vector<4x128xf32> -> vector<4x128xf32>
      %31 = arith.addf %26, %30 : vector<4x128xf32>
      %c1_i32_28 = arith.constant 1 : i32
      %32 = arith.addi %arg7, %c1_i32_28 : i32
      %33 = arith.index_cast %32 : i32 to index
      %c0_29 = arith.constant 0 : index
      %c0_30 = arith.constant 0 : index
      %34 = vector.load %arg6[%33, %c0_29, %c0_30] : memref<6x6x128xbf16, #tpu.memory_space<vmem>>, vector<1x6x128xbf16>
      %35 = vector.shape_cast %34 : vector<1x6x128xbf16> to vector<6x128xbf16>
      %36 = vector.extract_strided_slice %35 {offsets = [0, 0], sizes = [4, 128], strides = [1, 1]} : vector<6x128xbf16> to vector<4x128xbf16>
      %c3 = arith.constant 3 : index
      %c0_31 = arith.constant 0 : index
      %c0_32 = arith.constant 0 : index
      %37 = vector.load %arg3[%c3, %c0_31, %c0_32] : memref<9x128x128xbf16, #tpu.memory_space<vmem>>, vector<1x128x128xbf16>
      %38 = vector.shape_cast %37 : vector<1x128x128xbf16> to vector<128x128xbf16>
      %cst_33 = arith.constant dense<0.000000e+00> : vector<4x128xf32>
      %39 = tpu.matmul %36, %38, %cst_33 {dimension_numbers = #tpu.dot_dimension_numbers<[1], [0], [0], [1], [0, 0, 1, 1], [], []>} : vector<4x128xbf16>, vector<128x128xbf16>, vector<4x128xf32> -> vector<4x128xf32>
      %40 = arith.addf %31, %39 : vector<4x128xf32>
      %41 = vector.extract_strided_slice %35 {offsets = [1, 0], sizes = [4, 128], strides = [1, 1]} : vector<6x128xbf16> to vector<4x128xbf16>
      %c4 = arith.constant 4 : index
      %c0_34 = arith.constant 0 : index
      %c0_35 = arith.constant 0 : index
      %42 = vector.load %arg3[%c4, %c0_34, %c0_35] : memref<9x128x128xbf16, #tpu.memory_space<vmem>>, vector<1x128x128xbf16>
      %43 = vector.shape_cast %42 : vector<1x128x128xbf16> to vector<128x128xbf16>
      %cst_36 = arith.constant dense<0.000000e+00> : vector<4x128xf32>
      %44 = tpu.matmul %41, %43, %cst_36 {dimension_numbers = #tpu.dot_dimension_numbers<[1], [0], [0], [1], [0, 0, 1, 1], [], []>} : vector<4x128xbf16>, vector<128x128xbf16>, vector<4x128xf32> -> vector<4x128xf32>
      %45 = arith.addf %40, %44 : vector<4x128xf32>
      %46 = vector.extract_strided_slice %35 {offsets = [2, 0], sizes = [4, 128], strides = [1, 1]} : vector<6x128xbf16> to vector<4x128xbf16>
      %c5_37 = arith.constant 5 : index
      %c0_38 = arith.constant 0 : index
      %c0_39 = arith.constant 0 : index
      %47 = vector.load %arg3[%c5_37, %c0_38, %c0_39] : memref<9x128x128xbf16, #tpu.memory_space<vmem>>, vector<1x128x128xbf16>
      %48 = vector.shape_cast %47 : vector<1x128x128xbf16> to vector<128x128xbf16>
      %cst_40 = arith.constant dense<0.000000e+00> : vector<4x128xf32>
      %49 = tpu.matmul %46, %48, %cst_40 {dimension_numbers = #tpu.dot_dimension_numbers<[1], [0], [0], [1], [0, 0, 1, 1], [], []>} : vector<4x128xbf16>, vector<128x128xbf16>, vector<4x128xf32> -> vector<4x128xf32>
      %50 = arith.addf %45, %49 : vector<4x128xf32>
      %c2_i32 = arith.constant 2 : i32
      %51 = arith.addi %arg7, %c2_i32 : i32
      %52 = arith.index_cast %51 : i32 to index
      %c0_41 = arith.constant 0 : index
      %c0_42 = arith.constant 0 : index
      %53 = vector.load %arg6[%52, %c0_41, %c0_42] : memref<6x6x128xbf16, #tpu.memory_space<vmem>>, vector<1x6x128xbf16>
      %54 = vector.shape_cast %53 : vector<1x6x128xbf16> to vector<6x128xbf16>
      %55 = vector.extract_strided_slice %54 {offsets = [0, 0], sizes = [4, 128], strides = [1, 1]} : vector<6x128xbf16> to vector<4x128xbf16>
      %c6 = arith.constant 6 : index
      %c0_43 = arith.constant 0 : index
      %c0_44 = arith.constant 0 : index
      %56 = vector.load %arg3[%c6, %c0_43, %c0_44] : memref<9x128x128xbf16, #tpu.memory_space<vmem>>, vector<1x128x128xbf16>
      %57 = vector.shape_cast %56 : vector<1x128x128xbf16> to vector<128x128xbf16>
      %cst_45 = arith.constant dense<0.000000e+00> : vector<4x128xf32>
      %58 = tpu.matmul %55, %57, %cst_45 {dimension_numbers = #tpu.dot_dimension_numbers<[1], [0], [0], [1], [0, 0, 1, 1], [], []>} : vector<4x128xbf16>, vector<128x128xbf16>, vector<4x128xf32> -> vector<4x128xf32>
      %59 = arith.addf %50, %58 : vector<4x128xf32>
      %60 = vector.extract_strided_slice %54 {offsets = [1, 0], sizes = [4, 128], strides = [1, 1]} : vector<6x128xbf16> to vector<4x128xbf16>
      %c7 = arith.constant 7 : index
      %c0_46 = arith.constant 0 : index
      %c0_47 = arith.constant 0 : index
      %61 = vector.load %arg3[%c7, %c0_46, %c0_47] : memref<9x128x128xbf16, #tpu.memory_space<vmem>>, vector<1x128x128xbf16>
      %62 = vector.shape_cast %61 : vector<1x128x128xbf16> to vector<128x128xbf16>
      %cst_48 = arith.constant dense<0.000000e+00> : vector<4x128xf32>
      %63 = tpu.matmul %60, %62, %cst_48 {dimension_numbers = #tpu.dot_dimension_numbers<[1], [0], [0], [1], [0, 0, 1, 1], [], []>} : vector<4x128xbf16>, vector<128x128xbf16>, vector<4x128xf32> -> vector<4x128xf32>
      %64 = arith.addf %59, %63 : vector<4x128xf32>
      %65 = vector.extract_strided_slice %54 {offsets = [2, 0], sizes = [4, 128], strides = [1, 1]} : vector<6x128xbf16> to vector<4x128xbf16>
      %c8 = arith.constant 8 : index
      %c0_49 = arith.constant 0 : index
      %c0_50 = arith.constant 0 : index
      %66 = vector.load %arg3[%c8, %c0_49, %c0_50] : memref<9x128x128xbf16, #tpu.memory_space<vmem>>, vector<1x128x128xbf16>
      %67 = vector.shape_cast %66 : vector<1x128x128xbf16> to vector<128x128xbf16>
      %cst_51 = arith.constant dense<0.000000e+00> : vector<4x128xf32>
      %68 = tpu.matmul %65, %67, %cst_51 {dimension_numbers = #tpu.dot_dimension_numbers<[1], [0], [0], [1], [0, 0, 1, 1], [], []>} : vector<4x128xbf16>, vector<128x128xbf16>, vector<4x128xf32> -> vector<4x128xf32>
      %69 = arith.addf %64, %68 : vector<4x128xf32>
      %c0_52 = arith.constant 0 : index
      %70 = arith.index_cast %arg7 : i32 to index
      %c0_53 = arith.constant 0 : index
      %c0_54 = arith.constant 0 : index
      %71 = vector.load %arg4[%c0_52, %70, %c0_53, %c0_54] : memref<1x4x4x128xbf16, #tpu.memory_space<vmem>>, vector<1x1x4x128xbf16>
      %72 = vector.shape_cast %71 : vector<1x1x4x128xbf16> to vector<4x128xbf16>
      %73 = arith.extf %72 : vector<4x128xbf16> to vector<4x128xf32>
      %74 = arith.addf %69, %73 : vector<4x128xf32>
      %cst_55 = arith.constant 0.000000e+00 : f32
      %75 = vector.broadcast %cst_55 : f32 to vector<4x128xf32>
      %76 = arith.cmpf ogt, %74, %75 : vector<4x128xf32>
      %cst_56 = arith.constant 2.000000e-01 : f32
      %77 = vector.broadcast %cst_56 : f32 to vector<4x128xf32>
      %78 = arith.mulf %77, %74 : vector<4x128xf32>
      %79 = arith.select %76, %74, %78 : vector<4x128xi1>, vector<4x128xf32>
      %c0_57 = arith.constant 0 : index
      %80 = arith.index_cast %arg7 : i32 to index
      %c0_58 = arith.constant 0 : index
      %c0_59 = arith.constant 0 : index
      %81 = vector.load %arg5[%c0_57, %80, %c0_58, %c0_59] : memref<1x4x4x128xf32, #tpu.memory_space<vmem>>, vector<1x1x4x128xf32>
      %82 = vector.shape_cast %81 : vector<1x1x4x128xf32> to vector<4x128xf32>
      %83 = vector.shape_cast %79 : vector<4x128xf32> to vector<1x1x4x128xf32>
      tpu.vector_store %arg5[%c0_57, %80, %c0_58, %c0_59], %83 {strides = array<i32>} : memref<1x4x4x128xf32, #tpu.memory_space<vmem>>, vector<1x1x4x128xf32>,
    }
    %c4_i32_12 = arith.constant 4 : i32
    return
  }
  func.func @transform_0(%arg0: i32) -> (i32, i32, i32, i32) {
    %c0_i32 = arith.constant 0 : i32
    %c0_i32_0 = arith.constant 0 : i32
    %c0_i32_1 = arith.constant 0 : i32
    %c0_i32_2 = arith.constant 0 : i32
    return %arg0, %c0_i32, %c0_i32_0, %c0_i32_1 : i32, i32, i32, i32
  }
  func.func @transform_1(%arg0: i32) -> (i32, i32) {
    %c0_i32 = arith.constant 0 : i32
    %c0_i32_0 = arith.constant 0 : i32
    %c0_i32_1 = arith.constant 0 : i32
    return %c0_i32, %c0_i32_0 : i32, i32
  }
  func.func @transform_2(%arg0: i32) -> (i32, i32, i32) {
    %c0_i32 = arith.constant 0 : i32
    %c0_i32_0 = arith.constant 0 : i32
    %c0_i32_1 = arith.constant 0 : i32
    %c0_i32_2 = arith.constant 0 : i32
    return %c0_i32, %c0_i32_0, %c0_i32_1 : i32, i32, i32
  }
  func.func @transform_3(%arg0: i32) -> (i32, i32, i32, i32) {
    %c0_i32 = arith.constant 0 : i32
    %c0_i32_0 = arith.constant 0 : i32
    %c0_i32_1 = arith.constant 0 : i32
    %c0_i32_2 = arith.constant 0 : i32
    return %arg0, %c0_i32, %c0_i32_0, %c0_i32_1 : i32, i32, i32, i32
  }
  func.func @transform_4(%arg0: i32) -> (i32, i32, i32, i32) {
    %c0_i32 = arith.constant 0 : i32
    %c0_i32_0 = arith.constant 0 : i32
    %c0_i32_1 = arith.constant 0 : i32
    %c0_i32_2 = arith.constant 0 : i32
    return %arg0, %c0_i32, %c0_i32_0, %c0_i32_1 : i32, i32, i32, i32
  }
}

</mosaic_0001>

<bundles_post_ra>
// kernel: block_forward.3
= control target key start
LH: loop header
LB: loop body
LE: loop exit
PB: predicated region body
PF: predicated region fallthrough
CT: control target
= control target key end

     0   :  { %v273_v10 = vmov 0.0   ;;  %vm191_vm0 = vcmask 1040384   ;;  %s339_s1 = inlined_call_operand.vmem [shape: bf16[128,128], index: 1, kind: input, shape index: {}]   ;;  %s340_s0 = inlined_call_operand.vmem [shape: bf16[32,128], index: 0, kind: input, shape index: {}]   ;;  %s341_s3 = inlined_call_operand.vmem [shape: f32[2,128], index: 3, kind: output, shape index: {1}]   ;;  %s342_s2 = inlined_call_operand.vmem [shape: bf16[32,128], index: 2, kind: output, shape index: {0}]  }
   0x1   :  { %v263_v0 = vld [vmem:[%s339_s1] sm:$0xff]   ;;  %v264_v1 = vld [vmem:[%s339_s1 + $0x8] sm:$0xff]   ;;  %v265_v2 = vld [vmem:[%s339_s1 + $0x10] sm:$0xff]   ;;  %18 = vst [vmem:[%s341_s3] sm:$0x3] %v273_v10 }
   0x2   :  { %242 = vmatprep.subr.bf16.mxu0 %v263_v0  ;;  %v266_v3 = vld [vmem:[%s339_s1 + $0x18] sm:$0xff]   ;;  %v271_v4 = vld [vmem:[%s340_s0] sm:$0xff]   ;;  %v268_v6 = vld [vmem:[%s339_s1 + $0x28] sm:$0xff]  }
   0x3   :  { %243 = vmatpush3.bf16.msra.mxu0 %v263_v0  ;;  %258 = vmatprep.mubr.bf16.mxu0 %v271_v4  ;;  %v267_v5 = vld [vmem:[%s339_s1 + $0x20] sm:$0xff]   ;;  %v269_v7 = vld [vmem:[%s339_s1 + $0x30] sm:$0xff]   ;;  %v270_v8 = vld [vmem:[%s339_s1 + $0x38] sm:$0xff]  }
   0x4   :  { %244 = vmatprep.subr.bf16.mxu0 %v264_v1  ;;  %v272_v9 = vld [vmem:[%s340_s0 + $0x8] sm:$0xff]  }
   0x7   :  { %245 = vmatpush3.bf16.msra.mxu0 %v264_v1 }
   0x8   :  { %246 = vmatprep.subr.bf16.mxu0 %v265_v2  ;;  %v168_v37 = vld [vmem:[%s341_s3] sm:$0x3] }
   0xb   :  { %247 = vmatpush3.bf16.msra.mxu0 %v265_v2 }
   0xc   :  { %248 = vmatprep.subr.bf16.mxu0 %v266_v3 }
   0xf   :  { %249 = vmatpush3.bf16.msra.mxu0 %v266_v3 }
  0x10   :  { %250 = vmatprep.subr.bf16.mxu0 %v267_v5 }
  0x13   :  { %251 = vmatpush3.bf16.msra.mxu0 %v267_v5 }
  0x14   :  { %252 = vmatprep.subr.bf16.mxu0 %v268_v6 }
  0x17   :  { %253 = vmatpush3.bf16.msra.mxu0 %v268_v6 }
  0x18   :  { %254 = vmatprep.subr.bf16.mxu0 %v269_v7 }
  0x1b   :  { %255 = vmatpush3.bf16.msra.mxu0 %v269_v7 }
  0x1c   :  { %256 = vmatprep.subr.bf16.mxu0 %v270_v8 }
  0x1f   :  { %257 = vmatpush3.bf16.msra.mxu0 %v270_v8 }
  0x22   :  { %259 = vmatmul.mubr.bf16.vlgmr.msra.gmra.mrb[0].mxu0 %v272_v9 }
  0xf5   :  { %v260_v11 = vpop.f32.mrb[0].mxu0 }
  0xf6   :  { %v133_v12 = vpop.f32.mrb[1].mxu0  ;;  %v180_v20 = vmul.f32 %v260_v11, %v260_v11 }
  0xf7   :  { %v261_v13 = vpop.f32.mrb[2].mxu0  ;;  %v178_v16 = vmul.f32 %v133_v12, %v133_v12 }
  0xf8   :  { %v229_v14 = vpack.c.bf16 %v261_v13, %v260_v11  ;;  %v136_v15 = vpop.f32.mrb[3].mxu0  ;;  %v181_v23 = vmul.f32 %v261_v13, %v261_v13 }
  0xf9   :  { %v224_v17 = vpack.c.bf16 %v136_v15, %v133_v12  ;;  %v169_v18 = vadd.f32 %v136_v15, %v133_v12  ;;  %v179_v19 = vmul.f32 %v136_v15, %v136_v15 }
  0xfa   :  { %231 = vst [vmem:[%s342_s2 + $0x8] sm:$0xff] %v229_v14  }
  0xfb   :  { %225 = vst [vmem:[%s342_s2] sm:$0xff] %v224_v17   ;;  %v170_v21 = vadd.f32 %v260_v11, %v169_v18  ;;  %v182_v22 = vadd.f32 %v179_v19, %v178_v16 }
  0xfd   :  { %v171_v24 = vadd.f32 %v261_v13, %v170_v21  ;;  %v183_v25 = vadd.f32 %v182_v22, %v180_v20 }
  0xff   :  { %v172_v26 = vrot.slane %v171_v24, 4  ;;  %v184_v27 = vadd.f32 %v183_v25, %v181_v23 }
 0x101   :  { %v173_v28 = vadd.f32 %v172_v26, %v171_v24  ;;  %v185_v29 = vrot.slane %v184_v27, 4 }
 0x103   :  { %v174_v30 = vrot.slane %v173_v28, 2  ;;  %v186_v31 = vadd.f32 %v185_v29, %v184_v27 }
 0x105   :  { %v175_v32 = vadd.f32 %v174_v30, %v173_v28  ;;  %v187_v33 = vrot.slane %v186_v31, 2 }
 0x107   :  { %v176_v34 = vrot.slane %v175_v32, 1  ;;  %v188_v35 = vadd.f32 %v187_v33, %v186_v31 }
 0x109   :  { %v189_v36 = vrot.slane %v188_v35, 1  ;;  %v177_v38 = vadd.f32 %v176_v34, %v175_v32 }
 0x10b   :  { %v190_v39 = vadd.f32 %v189_v36, %v188_v35 }
 0x10d   :  { %v192_v40 = vsel %vm191_vm0, %v177_v38, %v190_v39 }
 0x10e   :  { %v193_v41 = vadd.f32 %v192_v40, %v168_v37 }
 0x110   :  { %194 = vst [vmem:[%s341_s3] sm:$0x3] %v193_v41 }

// kernel: block_forward.4
= control target key start
LH: loop header
LB: loop body
LE: loop exit
PB: predicated region body
PF: predicated region fallthrough
CT: control target
= control target key end

     0   :  { %s2171_s18 = smov 0   ;;  %s2574_s0 = inlined_call_operand.vmem [shape: bf16[2,4,4,128], index: 0, kind: input, shape index: {}]   ;;  %s2575_s1 = inlined_call_operand.vmem [shape: f32[2,128], index: 1, kind: input, shape index: {}]   ;;  %s2576_s2 = inlined_call_operand.vmem [shape: bf16[9,128,128], index: 2, kind: input, shape index: {}]   ;;  %s2577_s3 = inlined_call_operand.vmem [shape: bf16[2,4,4,128], index: 3, kind: output, shape index: {0}]   ;;  %s2578_s4 = inlined_call_operand.vmem [shape: bf16[2,4,4,128], index: 4, kind: output, shape index: {1}]   ;;  %s2579_s5 = inlined_call_operand.vmem [shape: f32[2,2,128], index: 5, kind: output, shape index: {2}]  }
   0x1 LB: > { %s1474_s19 = sadd.s32 4294967295, %s2124_s18   ;;  %p1478_p0 = scmp.ge.s32.totalorder %s2124_s18, 1  ;;  %s2124_s18 = sphi %s2171_s18, %s16_s18  }
   0x2   : > { %p192_p1 = scmp.lt.s32.totalorder %s2124_s18, 3 }
   0x4   : > { %p193_p2 = pnand %p1478_p0, %p192_p1 }
   0x5   : > { %p229_p3 = scmp.lt.s32.totalorder (!%p193_p2), %s1474_s19, 1  ;;  %v1487_v0 = vld [vmem:[%s2575_s1] ss:$0 sm:$0xff] (!%p193_p2)  ;;  %v1488_v1 = vld [vmem:[%s2575_s1 + $0x1] ss:$0 sm:$0xff] (!%p193_p2)  ;;  %v2138_v2 = vmov (!%p193_p2), 0  }
   0x6   : > { %196 = sbr.rel (%p193_p2) target bundleno = 431 (0x1af), region = 32  ;;  %251 = vst [vmem:[#allocation2] sm:$0x7] (!%p193_p2), %v2138_v2  ;;  %253 = vst [vmem:[#allocation2 + $0x14] sm:$0x7] (!%p193_p2), %v2138_v2  ;;  %s2126_s13 = smov (!%p193_p2), 0  }
   0xd   : > { %s2582_s19 = smov (!%p229_p3, %s1474_s19), 1 }
   0xe   : > { %s2185_s24 = sshll.u32 %s2582_s19, 3  ;;  %s1485_s25 = sshll.u32 %s2582_s19, 1 }
   0xf   : > { %s233_s28 = scalar_lea.vmem %s2574_s0, %s2185_s24  ;;  %s238_s6 = scalar_lea.vmem %s2577_s3, %s2185_s24 }
  0x10   : > { %s243_s9 = scalar_lea.vmem %s2578_s4, %s2185_s24  ;;  %s2202_s12 = scalar_lea.vmem %s2579_s5, %s1485_s25 }
  0x11 LB: >> { %s1486_s14 = sshll.u32 %s2128_s13, 1  ;;  %vm284_vm1 = vcmask 1040384   ;;  %vm286_vm2 = vcmask 1044480   ;;  %s1490_s22 = sshll.u32 %s2128_s13, 2  ;;  %s2128_s13 = sphi %s2126_s13, %s259_s13  }
  0x12   : >> { %s261_s17 = scalar_lea.vmem %s233_s28, %s1486_s14  ;;  %s279_s21 = scalar_lea.vmem %s238_s6, %s1486_s14 }
  0x13   : >> { %v262_v3 = vld [vmem:[%s261_s17] sm:$0x3]  ;;  %s1399_s23 = scalar_lea.vmem [#allocation2], %s1490_s22  ;;  %s259_s13 = sadd.s32 1, %s2128_s13  }
  0x14   : >> { %v263_v4 = vunpack.c.l.bf16 %v262_v3  ;;  %p256_p4 = scmp.ge.s32.totalorder %s259_s13, 4  }
  0x15   : > { %v2215_v14 = vmov (%p256_p4), 0.0   ;;  %s2217_s25 = smov (%p256_p4), 0  }
  0x16   : >> { %v268_v5 = vmul.f32 %v1487_v0, %v263_v4 }
  0x18   : >> { %v273_v6 = vadd.f32 %v1488_v1, %v268_v5 }
  0x1a   : >> { %vm274_vm0 = vcmp.gt.f32.partialorder %v273_v6, 0.0  ;;  %v275_v7 = vmul.f32 0.2, %v273_v6 }
  0x1c   : >> { %v276_v8 = vsel %vm274_vm0, %v273_v6, %v275_v7 }
  0x1d   : >> { %v277_v9 = vpack.c.bf16 %v276_v8, %v276_v8  ;;  %v282_v10 = vrot.slane %v276_v8, 7  ;;  %258 = sbr.rel (!%p256_p4) target bundleno = 17 (0x11), region = 116 }
  0x1f   : >> { %280 = vst [vmem:[%s279_s21] sm:$0x3] %v277_v9  ;;  %v285_v11 = vsel %vm284_vm1, 0.0, %v282_v10 }
  0x20   : >> { %v287_v12 = vsel %vm286_vm2, %v285_v11, 0.0 }
  0x21   : >> { %v288_v13 = vpack.c.bf16 %v287_v12, %v287_v12 }
  0x23   : >> { %1491 = vst [vmem:[%s1399_s23 + $0x4] sm:$0x7] %v288_v13 }
  0x24 LB: >> { %v2031_v15 = vld [vmem:[%s2576_s2 + $0x40] sm:$0xff]   ;;  %v2139_v16 = vmov 0.0   ;;  %v2033_v18 = vld [vmem:[%s2576_s2 + $0x48] sm:$0xff]   ;;  %vm2140_vm3 = vmmov 0   ;;  %v2035_v20 = vld [vmem:[%s2576_s2 + $0x50] sm:$0xff]   ;;  %s1492_s17 = sshll.u32 %s2136_s25, 2  ;;  %s2136_s25 = sphi %s2217_s25, %s298_s25   ;;  %v2132_v14 = vphi %v2215_v14, %v2580_v14  }
  0x25   : >> { %1787 = vmatprep.subr.bf16.mxu1 %v2139_v16  ;;  %1867 = vmatprep.subr.bf16.mxu0 %v2139_v16  ;;  %v2032_v17 = vld [vmem:[%s2576_s2 + $0x100] sm:$0xff]   ;;  %v2034_v19 = vld [vmem:[%s2576_s2 + $0x108] sm:$0xff]   ;;  %v2036_v21 = vld [vmem:[%s2576_s2 + $0x110] sm:$0xff]   ;;  %s2270_s27 = scalar_lea.vmem [#allocation2], %s1492_s17  ;;  %vm1305_vm4 = vcmask 1043456  }
  0x26   : >> { %1788 = vmatpush3.bf16.msra.mxu1 %v2031_v15  ;;  %1803 = vmatprep.mubr.msk.bf16.mxu1 %vm2140_vm3, %v2139_v16  ;;  %v2037_v22 = vld [vmem:[%s2576_s2 + $0x58] sm:$0xff]   ;;  %v2039_v24 = vld [vmem:[%s2576_s2 + $0x60] sm:$0xff]   ;;  %v2041_v29 = vld [vmem:[%s2576_s2 + $0x68] sm:$0xff]  }
  0x27   : >> { %1868 = vmatpush3.bf16.msra.mxu0 %v2032_v17  ;;  %1789 = vmatprep.subr.bf16.mxu1 %v2139_v16  ;;  %v2038_v23 = vld [vmem:[%s2576_s2 + $0x118] sm:$0xff]   ;;  %v2040_v25 = vld [vmem:[%s2576_s2 + $0x120] sm:$0xff]   ;;  %v2042_v31 = vld [vmem:[%s2576_s2 + $0x128] sm:$0xff]  }
  0x28   : >> { %1869 = vmatprep.subr.bf16.mxu0 %v2139_v16  ;;  %1883 = vmatprep.mubr.msk.bf16.mxu0 %vm2140_vm3, %v2139_v16  ;;  %v2043_v33 = vld [vmem:[%s2576_s2 + $0x70] sm:$0xff]   ;;  %v2045_v36 = vld [vmem:[%s2576_s2 + $0x78] sm:$0xff]   ;;  %v2048_v43 = vld [vmem:[%s2576_s2] sm:$0xff]  }
  0x29   : >> { %v2044_v35 = vld [vmem:[%s2576_s2 + $0x130] sm:$0xff]   ;;  %v2046_v41 = vld [vmem:[%s2576_s2 + $0x138] sm:$0xff]   ;;  %v2050_v45 = vld [vmem:[%s2576_s2 + $0x140] sm:$0xff]  }
  0x2a   : >> { %1790 = vmatpush3.bf16.msra.mxu1 %v2033_v18  ;;  %v2273_v26 = vld [vmem:[%s2270_s27] sm:$0x7]  ;;  %v2280_v28 = vld [vmem:[%s2270_s27 + $0x4] sm:$0x7]  ;;  %v2051_v46 = vld [vmem:[%s2576_s2 + $0x8] sm:$0xff]  }
  0x2b   : >> { %1870 = vmatpush3.bf16.msra.mxu0 %v2034_v19  ;;  %1791 = vmatprep.subr.bf16.mxu1 %v2139_v16  ;;  %v2277_v27 = vcombine.low %v2273_v26, %v2273_v26  ;;  %v2287_v30 = vcombine.low %v2280_v28, %v2280_v28  ;;  %v2052_v47 = vld [vmem:[%s2576_s2 + $0x148] sm:$0xff]   ;;  %v2053_v48 = vld [vmem:[%s2576_s2 + $0x10] sm:$0xff]   ;;  %v2055_v50 = vld [vmem:[%s2576_s2 + $0x18] sm:$0xff]  }
  0x2c   : >> { %1871 = vmatprep.subr.bf16.mxu0 %v2139_v16  ;;  %v2054_v49 = vld [vmem:[%s2576_s2 + $0x150] sm:$0xff]   ;;  %v2056_v51 = vld [vmem:[%s2576_s2 + $0x158] sm:$0xff]   ;;  %v2057_v52 = vld [vmem:[%s2576_s2 + $0x20] sm:$0xff]  }
  0x2d   : >> { %v342_v32 = vshll.u32 %v2277_v27, 16  ;;  %v764_v34 = vshll.u32 %v2287_v30, 16  ;;  %v340_v37 = vshrl.u32 %v2277_v27, 16  ;;  %v762_v39 = vshrl.u32 %v2287_v30, 16  ;;  %v2058_v53 = vld [vmem:[%s2576_s2 + $0x160] sm:$0xff]   ;;  %v2059_v54 = vld [vmem:[%s2576_s2 + $0x28] sm:$0xff]  }
  0x2e   : >> { %1792 = vmatpush3.bf16.msra.mxu1 %v2035_v20  ;;  %v2060_v55 = vld [vmem:[%s2576_s2 + $0x168] sm:$0xff]   ;;  %v2061_v56 = vld [vmem:[%s2576_s2 + $0x30] sm:$0xff]   ;;  %v2063_v58 = vld [vmem:[%s2576_s2 + $0x38] sm:$0xff]   ;;  %v875_v61 = vrot.slane %v2287_v30, 1  ;;  %v540_v13 = vrot.slane %v2277_v27, 1 }
  0x2f   : >> { %1872 = vmatpush3.bf16.msra.mxu0 %v2036_v21  ;;  %1793 = vmatprep.subr.bf16.mxu1 %v2139_v16  ;;  %v344_v38 = vrot.slane %v342_v32, 1  ;;  %v766_v40 = vrot.slane %v764_v34, 1  ;;  %v2062_v57 = vld [vmem:[%s2576_s2 + $0x170] sm:$0xff]   ;;  %v2064_v59 = vld [vmem:[%s2576_s2 + $0x178] sm:$0xff]   ;;  %v2065_v60 = vld [vmem:[%s2576_s2 + $0x80] sm:$0xff]  }
  0x30   : >> { %1873 = vmatprep.subr.bf16.mxu0 %v2139_v16  ;;  %v2066_v62 = vld [vmem:[%s2576_s2 + $0x180] sm:$0xff]   ;;  %v2067_v63 = vld [vmem:[%s2576_s2 + $0x88] sm:$0xff]   ;;  %v2069_v1 = vld [vmem:[%s2576_s2 + $0x90] sm:$0xff]  }
  0x31   : >> { %v345_v42 = vor.u32 %v344_v38, %v340_v37  ;;  %v767_v44 = vor.u32 %v766_v40, %v762_v39  ;;  %v2068_v0 = vld [vmem:[%s2576_s2 + $0x188] sm:$0xff]   ;;  %v2070_v2 = vld [vmem:[%s2576_s2 + $0x190] sm:$0xff]   ;;  %v2071_v3 = vld [vmem:[%s2576_s2 + $0x98] sm:$0xff]  }
  0x32   : >> { %1794 = vmatpush3.bf16.msra.mxu1 %v2037_v22  ;;  %v2072_v4 = vld [vmem:[%s2576_s2 + $0x198] sm:$0xff]   ;;  %v2073_v5 = vld [vmem:[%s2576_s2 + $0xa0] sm:$0xff]   ;;  %v2075_v7 = vld [vmem:[%s2576_s2 + $0xa8] sm:$0xff]  }
  0x33   : >> { %1874 = vmatpush3.bf16.msra.mxu0 %v2038_v23  ;;  %1795 = vmatprep.subr.bf16.mxu1 %v2139_v16  ;;  %v2074_v6 = vld [vmem:[%s2576_s2 + $0x1a0] sm:$0xff]   ;;  %v2076_v8 = vld [vmem:[%s2576_s2 + $0x1a8] sm:$0xff]   ;;  %v2077_v9 = vld [vmem:[%s2576_s2 + $0xb0] sm:$0xff]  }
  0x34   : >> { %1875 = vmatprep.subr.bf16.mxu0 %v2139_v16  ;;  %v2078_v10 = vld [vmem:[%s2576_s2 + $0x1b0] sm:$0xff]   ;;  %v2079_v11 = vld [vmem:[%s2576_s2 + $0xb8] sm:$0xff]   ;;  %v2081_v15 = vld [vmem:[%s2576_s2 + $0xc0] sm:$0xff]  }
  0x35   : >> { %v2080_v12 = vld [vmem:[%s2576_s2 + $0x1b8] sm:$0xff]   ;;  %v1626_v17 = vld [vmem:[%s2270_s27 + $0x8] sm:$0x7]  ;;  %v2083_v18 = vld [vmem:[%s2576_s2 + $0x1c0] sm:$0xff]   ;;  %s1700_s27 = sshll.u32 %s2136_s25, 1  ;;  %s298_s25 = sadd.s32 1, %s2136_s25  }
  0x36   : >> { %1796 = vmatpush3.bf16.msra.mxu1 %v2039_v24  ;;  %v2084_v19 = vld [vmem:[%s2576_s2 + $0xc8] sm:$0xff]   ;;  %v2086_v21 = vld [vmem:[%s2576_s2 + $0xd0] sm:$0xff]   ;;  %v2088_v23 = vld [vmem:[%s2576_s2 + $0xd8] sm:$0xff]   ;;  %v1667_v27 = vcombine.low %v1626_v17, %v1626_v17  ;;  %s1303_s15 = scalar_lea.vmem %s243_s9, %s1700_s27  ;;  %p295_p5 = scmp.ge.s32.totalorder %s298_s25, 4  }
  0x37   : >> { %1876 = vmatpush3.bf16.msra.mxu0 %v2040_v25  ;;  %1797 = vmatprep.subr.bf16.mxu1 %v2139_v16  ;;  %v2085_v20 = vld [vmem:[%s2576_s2 + $0x1c8] sm:$0xff]   ;;  %v2087_v22 = vld [vmem:[%s2576_s2 + $0x1d0] sm:$0xff]   ;;  %v2089_v24 = vld [vmem:[%s2576_s2 + $0x1d8] sm:$0xff]  }
  0x38   : >> { %1877 = vmatprep.subr.bf16.mxu0 %v2139_v16  ;;  %v2090_v25 = vld [vmem:[%s2576_s2 + $0xe0] sm:$0xff]   ;;  %v2093_v30 = vld [vmem:[%s2576_s2 + $0x1e8] sm:$0xff]   ;;  %v2094_v32 = vld [vmem:[%s2576_s2 + $0xf0] sm:$0xff]   ;;  %v1097_v34 = vshrl.u32 %v1667_v27, 16 }
  0x39   : >> { %v2097_v37 = vld [vmem:[%s2576_s2 + $0x1f8] sm:$0xff]   ;;  %v2098_v39 = vld [vmem:[%s2576_s2 + $0x200] sm:$0xff]   ;;  %v2099_v40 = vld [vmem:[%s2576_s2 + $0x208] sm:$0xff]  }
  0x3a   : >> { %1798 = vmatpush3.bf16.msra.mxu1 %v2041_v29  ;;  %v2092_v29 = vld [vmem:[%s2576_s2 + $0xe8] sm:$0xff]  }
  0x3b   : >> { %1878 = vmatpush3.bf16.msra.mxu0 %v2042_v31  ;;  %1799 = vmatprep.subr.bf16.mxu1 %v2139_v16  ;;  %v1099_v31 = vshll.u32 %v1667_v27, 16 }
  0x3c   : >> { %1879 = vmatprep.subr.bf16.mxu0 %v2139_v16 }
  0x3e   : >> { %1800 = vmatpush3.bf16.msra.mxu1 %v2043_v33  ;;  %v2095_v33 = vld [vmem:[%s2576_s2 + $0x1f0] sm:$0xff]  }
  0x3f   : >> { %1880 = vmatpush3.bf16.msra.mxu0 %v2044_v35  ;;  %1801 = vmatprep.subr.bf16.mxu1 %v2139_v16  ;;  %v2096_v35 = vld [vmem:[%s2576_s2 + $0xf8] sm:$0xff]  }
  0x40   : >> { %1881 = vmatprep.subr.bf16.mxu0 %v2139_v16 }
  0x42   : >> { %1802 = vmatpush3.bf16.msra.mxu1 %v2045_v36  ;;  %v1101_v36 = vrot.slane %v1099_v31, 1 }
  0x43   : >> { %1882 = vmatpush3.bf16.msra.mxu0 %v2046_v41  ;;  %1807 = vmatprep.subr.bf16.mxu1 %v2139_v16  ;;  %v2100_v41 = vld [vmem:[%s2576_s2 + $0x210] sm:$0xff]  }
  0x44   : >> { %1887 = vmatprep.subr.bf16.mxu0 %v2139_v16  ;;  %v1102_v38 = vor.u32 %v1101_v36, %v1097_v34 }
  0x45   : >> { %1804 = vmatmul.mubr.bf16.vlgmr.msra.gmra.mrb[0].mxu1 %v345_v42  ;;  %v2102_v42 = vld [vmem:[%s2576_s2 + $0x220] sm:$0xff]  }
  0x46   : >> { %1808 = vmatpush3.bf16.msra.mxu1 %v2048_v43  ;;  %1884 = vmatmul.mubr.bf16.vlgmr.msra.gmra.mrb[0].mxu0 %v767_v44  ;;  %v2103_v43 = vld [vmem:[%s2576_s2 + $0x228] sm:$0xff]   ;;  %v2104_v44 = vld [vmem:[%s2576_s2 + $0x230] sm:$0xff]  }
  0x47   : >> { %1888 = vmatpush3.bf16.msra.mxu0 %v2050_v45  ;;  %1809 = vmatprep.subr.bf16.mxu1 %v2139_v16  ;;  %v2105_v45 = vld [vmem:[%s2576_s2 + $0x238] sm:$0xff]  }
  0x48   : >> { %1889 = vmatprep.subr.bf16.mxu0 %v2139_v16  ;;  %1823 = vmatprep.mubr.msk.bf16.mxu1 %vm2140_vm3, %v2139_v16 }
  0x49   : >> { %1903 = vmatprep.mubr.msk.bf16.mxu0 %vm2140_vm3, %v2139_v16 }
  0x4a   : >> { %1810 = vmatpush3.bf16.msra.mxu1 %v2051_v46  ;;  %v1210_v46 = vrot.slane %v1667_v27, 1 }
  0x4b   : >> { %1890 = vmatpush3.bf16.msra.mxu0 %v2052_v47  ;;  %1811 = vmatprep.subr.bf16.mxu1 %v2139_v16 }
  0x4c   : >> { %1891 = vmatprep.subr.bf16.mxu0 %v2139_v16 }
  0x4e   : >> { %1812 = vmatpush3.bf16.msra.mxu1 %v2053_v48 }
  0x4f   : >> { %1892 = vmatpush3.bf16.msra.mxu0 %v2054_v49  ;;  %1813 = vmatprep.subr.bf16.mxu1 %v2139_v16 }
  0x50   : >> { %1893 = vmatprep.subr.bf16.mxu0 %v2139_v16 }
  0x52   : >> { %1814 = vmatpush3.bf16.msra.mxu1 %v2055_v50 }
  0x53   : >> { %1894 = vmatpush3.bf16.msra.mxu0 %v2056_v51  ;;  %1815 = vmatprep.subr.bf16.mxu1 %v2139_v16 }
  0x54   : >> { %1895 = vmatprep.subr.bf16.mxu0 %v2139_v16 }
  0x56   : >> { %1816 = vmatpush3.bf16.msra.mxu1 %v2057_v52 }
  0x57   : >> { %1896 = vmatpush3.bf16.msra.mxu0 %v2058_v53  ;;  %1817 = vmatprep.subr.bf16.mxu1 %v2139_v16 }
  0x58   : >> { %1897 = vmatprep.subr.bf16.mxu0 %v2139_v16 }
  0x5a   : >> { %1818 = vmatpush3.bf16.msra.mxu1 %v2059_v54 }
  0x5b   : >> { %1898 = vmatpush3.bf16.msra.mxu0 %v2060_v55  ;;  %1819 = vmatprep.subr.bf16.mxu1 %v2139_v16 }
  0x5c   : >> { %1899 = vmatprep.subr.bf16.mxu0 %v2139_v16 }
  0x5e   : >> { %1820 = vmatpush3.bf16.msra.mxu1 %v2061_v56 }
  0x5f   : >> { %1900 = vmatpush3.bf16.msra.mxu0 %v2062_v57  ;;  %1821 = vmatprep.subr.bf16.mxu1 %v2139_v16 }
  0x60   : >> { %1901 = vmatprep.subr.bf16.mxu0 %v2139_v16 }
  0x62   : >> { %1822 = vmatpush3.bf16.msra.mxu1 %v2063_v58 }
  0x63   : >> { %1902 = vmatpush3.bf16.msra.mxu0 %v2064_v59  ;;  %1827 = vmatprep.subr.bf16.mxu1 %v2139_v16 }
  0x64   : >> { %1907 = vmatprep.subr.bf16.mxu0 %v2139_v16 }
  0x65   : >> { %1824 = vmatmul.mubr.bf16.vlgmr.msra.gmra.mrb[0].mxu1 %v2273_v26  ;;  %v2091_v26 = vld [vmem:[%s2576_s2 + $0x1e0] sm:$0xff]  }
  0x66   : >> { %1828 = vmatpush3.bf16.msra.mxu1 %v2065_v60  ;;  %1904 = vmatmul.mubr.bf16.vlgmr.msra.gmra.mrb[0].mxu0 %v875_v61 }
  0x67   : >> { %1908 = vmatpush3.bf16.msra.mxu0 %v2066_v62  ;;  %1829 = vmatprep.subr.bf16.mxu1 %v2139_v16 }
  0x68   : >> { %1909 = vmatprep.subr.bf16.mxu0 %v2139_v16  ;;  %1843 = vmatprep.mubr.msk.bf16.mxu1 %vm2140_vm3, %v2139_v16 }
  0x69   : >> { %1923 = vmatprep.mubr.msk.bf16.mxu0 %vm2140_vm3, %v2139_v16 }
  0x6a   : >> { %1830 = vmatpush3.bf16.msra.mxu1 %v2067_v63 }
  0x6b   : >> { %1910 = vmatpush3.bf16.msra.mxu0 %v2068_v0  ;;  %1831 = vmatprep.subr.bf16.mxu1 %v2139_v16 }
  0x6c   : >> { %1911 = vmatprep.subr.bf16.mxu0 %v2139_v16 }
  0x6e   : >> { %1832 = vmatpush3.bf16.msra.mxu1 %v2069_v1 }
  0x6f   : >> { %1912 = vmatpush3.bf16.msra.mxu0 %v2070_v2  ;;  %1833 = vmatprep.subr.bf16.mxu1 %v2139_v16 }
  0x70   : >> { %1913 = vmatprep.subr.bf16.mxu0 %v2139_v16 }
  0x72   : >> { %1834 = vmatpush3.bf16.msra.mxu1 %v2071_v3 }
  0x73   : >> { %1914 = vmatpush3.bf16.msra.mxu0 %v2072_v4  ;;  %1835 = vmatprep.subr.bf16.mxu1 %v2139_v16 }
  0x74   : >> { %1915 = vmatprep.subr.bf16.mxu0 %v2139_v16 }
  0x76   : >> { %1836 = vmatpush3.bf16.msra.mxu1 %v2073_v5 }
  0x77   : >> { %1916 = vmatpush3.bf16.msra.mxu0 %v2074_v6  ;;  %1837 = vmatprep.subr.bf16.mxu1 %v2139_v16 }
  0x78   : >> { %1917 = vmatprep.subr.bf16.mxu0 %v2139_v16 }
  0x7a   : >> { %1838 = vmatpush3.bf16.msra.mxu1 %v2075_v7 }
  0x7b   : >> { %1918 = vmatpush3.bf16.msra.mxu0 %v2076_v8  ;;  %1839 = vmatprep.subr.bf16.mxu1 %v2139_v16 }
  0x7c   : >> { %1919 = vmatprep.subr.bf16.mxu0 %v2139_v16 }
  0x7e   : >> { %1840 = vmatpush3.bf16.msra.mxu1 %v2077_v9 }
  0x7f   : >> { %1920 = vmatpush3.bf16.msra.mxu0 %v2078_v10  ;;  %1841 = vmatprep.subr.bf16.mxu1 %v2139_v16 }
  0x80   : >> { %1921 = vmatprep.subr.bf16.mxu0 %v2139_v16 }
  0x82   : >> { %1842 = vmatpush3.bf16.msra.mxu1 %v2079_v11 }
  0x83   : >> { %1922 = vmatpush3.bf16.msra.mxu0 %v2080_v12  ;;  %1847 = vmatprep.subr.bf16.mxu1 %v2139_v16 }
  0x84   : >> { %1927 = vmatprep.subr.bf16.mxu0 %v2139_v16 }
  0x85   : >> { %1844 = vmatmul.mubr.bf16.vlgmr.msra.gmra.mrb[0].mxu1 %v540_v13 }
  0x86   : >> { %1848 = vmatpush3.bf16.msra.mxu1 %v2081_v15  ;;  %1924 = vmatmul.mubr.bf16.vlgmr.msra.gmra.mrb[0].mxu0 %v1626_v17 }
  0x87   : >> { %1928 = vmatpush3.bf16.msra.mxu0 %v2083_v18  ;;  %1849 = vmatprep.subr.bf16.mxu1 %v2139_v16 }
  0x88   : >> { %1929 = vmatprep.subr.bf16.mxu0 %v2139_v16  ;;  %1863 = vmatprep.mubr.msk.bf16.mxu1 %vm2140_vm3, %v2139_v16 }
  0x89   : >> { %1943 = vmatprep.mubr.msk.bf16.mxu0 %vm2140_vm3, %v2139_v16 }
  0x8a   : >> { %1850 = vmatpush3.bf16.msra.mxu1 %v2084_v19 }
  0x8b   : >> { %1930 = vmatpush3.bf16.msra.mxu0 %v2085_v20  ;;  %1851 = vmatprep.subr.bf16.mxu1 %v2139_v16 }
  0x8c   : >> { %1931 = vmatprep.subr.bf16.mxu0 %v2139_v16 }
  0x8e   : >> { %1852 = vmatpush3.bf16.msra.mxu1 %v2086_v21 }
  0x8f   : >> { %1932 = vmatpush3.bf16.msra.mxu0 %v2087_v22  ;;  %1853 = vmatprep.subr.bf16.mxu1 %v2139_v16 }
  0x90   : >> { %1933 = vmatprep.subr.bf16.mxu0 %v2139_v16 }
  0x92   : >> { %1854 = vmatpush3.bf16.msra.mxu1 %v2088_v23 }
  0x93   : >> { %1934 = vmatpush3.bf16.msra.mxu0 %v2089_v24  ;;  %1855 = vmatprep.subr.bf16.mxu1 %v2139_v16 }
  0x94   : >> { %1935 = vmatprep.subr.bf16.mxu0 %v2139_v16 }
  0x96   : >> { %1856 = vmatpush3.bf16.msra.mxu1 %v2090_v25 }
  0x97   : >> { %1936 = vmatpush3.bf16.msra.mxu0 %v2091_v26  ;;  %1857 = vmatprep.subr.bf16.mxu1 %v2139_v16 }
  0x98   : >> { %1937 = vmatprep.subr.bf16.mxu0 %v2139_v16 }
  0x9a   : >> { %1858 = vmatpush3.bf16.msra.mxu1 %v2092_v29 }
  0x9b   : >> { %1938 = vmatpush3.bf16.msra.mxu0 %v2093_v30  ;;  %1859 = vmatprep.subr.bf16.mxu1 %v2139_v16 }
  0x9c   : >> { %1939 = vmatprep.subr.bf16.mxu0 %v2139_v16 }
  0x9e   : >> { %1860 = vmatpush3.bf16.msra.mxu1 %v2094_v32 }
  0x9f   : >> { %1940 = vmatpush3.bf16.msra.mxu0 %v2095_v33  ;;  %1861 = vmatprep.subr.bf16.mxu1 %v2139_v16 }
  0xa0   : >> { %1941 = vmatprep.subr.bf16.mxu0 %v2139_v16 }
  0xa2   : >> { %1862 = vmatpush3.bf16.msra.mxu1 %v2096_v35 }
  0xa3   : >> { %1942 = vmatpush3.bf16.msra.mxu0 %v2097_v37 }
  0xa4   : >> { %1947 = vmatprep.subr.bf16.mxu0 %v2139_v16 }
  0xa5   : >> { %1864 = vmatmul.mubr.bf16.vlgmr.msra.gmra.mrb[0].mxu1 %v2280_v28  ;;  %v2101_v28 = vld [vmem:[%s2576_s2 + $0x218] sm:$0xff]  }
  0xa6   : >> { %1944 = vmatmul.mubr.bf16.vlgmr.msra.gmra.mrb[0].mxu0 %v1102_v38 }
  0xa7   : >> { %1948 = vmatpush3.bf16.msra.mxu0 %v2098_v39  ;;  %1963 = vmatprep.mubr.msk.bf16.mxu0 %vm2140_vm3, %v2139_v16 }
  0xa8   : >> { %1949 = vmatprep.subr.bf16.mxu0 %v2139_v16 }
  0xab   : >> { %1950 = vmatpush3.bf16.msra.mxu0 %v2099_v40 }
  0xac   : >> { %1951 = vmatprep.subr.bf16.mxu0 %v2139_v16 }
  0xaf   : >> { %1952 = vmatpush3.bf16.msra.mxu0 %v2100_v41 }
  0xb0   : >> { %1953 = vmatprep.subr.bf16.mxu0 %v2139_v16 }
  0xb3   : >> { %1954 = vmatpush3.bf16.msra.mxu0 %v2101_v28 }
  0xb4   : >> { %1955 = vmatprep.subr.bf16.mxu0 %v2139_v16 }
  0xb7   : >> { %1956 = vmatpush3.bf16.msra.mxu0 %v2102_v42 }
  0xb8   : >> { %1957 = vmatprep.subr.bf16.mxu0 %v2139_v16 }
  0xbb   : >> { %1958 = vmatpush3.bf16.msra.mxu0 %v2103_v43 }
  0xbc   : >> { %1959 = vmatprep.subr.bf16.mxu0 %v2139_v16 }
  0xbf   : >> { %1960 = vmatpush3.bf16.msra.mxu0 %v2104_v44 }
  0xc0   : >> { %1961 = vmatprep.subr.bf16.mxu0 %v2139_v16 }
  0xc3   : >> { %1962 = vmatpush3.bf16.msra.mxu0 %v2105_v45 }
  0xc6   : >> { %1964 = vmatmul.mubr.bf16.vlgmr.msra.gmra.mrb[0].mxu0 %v1210_v46 }
 0x178   : >> { %v734_v47 = vpop.f32.mrb[0].mxu1 }
 0x179   : >> { %v1865_v48 = vpop.f32.mrb[1].mxu1 }
 0x17a   : >> { %v737_v49 = vpop.f32.mrb[2].mxu1 }
 0x17b   : >> { %v1866_v50 = vpop.f32.mrb[3].mxu1 }
 0x199   : >> { %v1294_v51 = vpop.f32.mrb[0].mxu0 }
 0x19a   : >> { %v1967_v52 = vadd.f32 %v1294_v51, %v734_v47  ;;  %v1965_v53 = vpop.f32.mrb[1].mxu0 }
 0x19b   : >> { %v1297_v54 = vpop.f32.mrb[2].mxu0 }
 0x19c   : >> { %v1301_v55 = vpack.c.bf16 %v1967_v52, %v1967_v52  ;;  %v1306_v16 = vsel %vm1305_vm4, %v1967_v52, 0.0  ;;  %v1313_v56 = vmul.f32 %v1967_v52, %v1967_v52  ;;  %v1966_v57 = vpop.f32.mrb[3].mxu0 }
 0x19d   : >> { %v1307_v58 = vrot.slane %v1306_v16, 4 }
 0x19e   : >> { %1304 = vst [vmem:[%s1303_s15] sm:$0x3] %v1301_v55  ;;  %v1314_v59 = vsel %vm1305_vm4, %v1313_v56, 0.0 }
 0x19f   : >> { %v1308_v60 = vadd.f32 %v1307_v58, %v1306_v16  ;;  %v1315_v61 = vrot.slane %v1314_v59, 4 }
 0x1a1   : >> { %v1309_v62 = vrot.slane %v1308_v60, 2  ;;  %v1316_v63 = vadd.f32 %v1315_v61, %v1314_v59 }
 0x1a3   : >> { %v1310_v0 = vadd.f32 %v1309_v62, %v1308_v60  ;;  %v1317_v1 = vrot.slane %v1316_v63, 2 }
 0x1a5   : >> { %v1311_v2 = vrot.slane %v1310_v0, 1  ;;  %v1318_v3 = vadd.f32 %v1317_v1, %v1316_v63 }
 0x1a7   : >> { %v1319_v4 = vrot.slane %v1318_v3, 1  ;;  %v1312_v5 = vadd.f32 %v1311_v2, %v1310_v0 }
 0x1a8   : > { %297 = sbr.rel (!%p295_p5) target bundleno = 36 (0x24), region = 127 }
 0x1a9   : >> { %v1320_v6 = vadd.f32 %v1319_v4, %v1318_v3 }
 0x1ab   : >> { %v1322_v7 = vsel %vm284_vm1, %v1312_v5, %v1320_v6 }
 0x1ac   : >> { %v1323_v8 = vadd.f32 %v2132_v14, %v1322_v7  }
 0x1ae   : >> { %v2580_v14 = vmov %v1323_v8  ;;  %1324 = vst [vmem:[%s2202_s12] sm:$0x3] (%p295_p5), %v1323_v8 }
 0x1af PF: > { %s16_s18 = sadd.s32 1, %s2124_s18  }
 0x1b0   : > { %p13_p6 = scmp.ge.s32.totalorder %s16_s18, 4  }
 0x1b2   :  { %15 = sbr.rel (!%p13_p6) target bundleno = 1 (0x1), region = 138 }

// kernel: block_forward.5
= control target key start
LH: loop header
LB: loop body
LE: loop exit
PB: predicated region body
PF: predicated region fallthrough
CT: control target
= control target key end

     0   :  { %s2017_s15 = smov 0   ;;  %s2379_s0 = inlined_call_operand.vmem [shape: bf16[2,4,4,128], index: 0, kind: input, shape index: {}]   ;;  %s2380_s1 = inlined_call_operand.vmem [shape: f32[2,128], index: 1, kind: input, shape index: {}]   ;;  %s2381_s2 = inlined_call_operand.vmem [shape: bf16[9,128,128], index: 2, kind: input, shape index: {}]   ;;  %s2382_s3 = inlined_call_operand.vmem [shape: bf16[2,4,4,128], index: 3, kind: input, shape index: {}]   ;;  %s2383_s4 = inlined_call_operand.vmem [shape: f32[2,4,4,128], index: 4, kind: output, shape index: {}]  }
   0x1 LB: > { %s1371_s16 = sadd.s32 4294967295, %s1979_s15   ;;  %p1375_p0 = scmp.ge.s32.totalorder %s1979_s15, 1  ;;  %s1979_s15 = sphi %s2017_s15, %s14_s15  }
   0x2   : > { %p172_p1 = scmp.lt.s32.totalorder %s1979_s15, 3 }
   0x4   : > { %p173_p2 = pnand %p1375_p0, %p172_p1 }
   0x5   : > { %p203_p3 = scmp.lt.s32.totalorder (!%p173_p2), %s1371_s16, 1  ;;  %v1383_v0 = vld [vmem:[%s2380_s1] ss:$0 sm:$0xff] (!%p173_p2)  ;;  %v1384_v1 = vld [vmem:[%s2380_s1 + $0x1] ss:$0 sm:$0xff] (!%p173_p2)  ;;  %v1989_v2 = vmov (!%p173_p2), 0  }
   0x6   : > { %176 = sbr.rel (%p173_p2) target bundleno = 417 (0x1a1), region = 36  ;;  %221 = vst [vmem:[#allocation2] sm:$0x7] (!%p173_p2), %v1989_v2  ;;  %223 = vst [vmem:[#allocation2 + $0x14] sm:$0x7] (!%p173_p2), %v1989_v2  ;;  %s1981_s6 = smov (!%p173_p2), 0  }
   0xd   : > { %s2385_s16 = smov (!%p203_p3, %s1371_s16), 1 }
   0xe   : > { %s1599_s21 = sshll.u32 %s2385_s16, 3  ;;  %s1601_s22 = sshll.u32 %s2385_s16, 4 }
   0xf   : > { %s207_s25 = scalar_lea.vmem %s2379_s0, %s1599_s21  ;;  %s2037_s28 = scalar_lea.vmem %s2382_s3, %s1599_s21 }
  0x10   : > { %s2042_s5 = scalar_lea.vmem %s2383_s4, %s1601_s22 }
  0x11 LB: >> { %s1382_s7 = sshll.u32 %s1983_s6, 1  ;;  %vm250_vm1 = vcmask 1040384   ;;  %vm252_vm2 = vcmask 1044480   ;;  %s1385_s9 = sshll.u32 %s1983_s6, 2  ;;  %s1983_s6 = sphi %s1981_s6, %s229_s6  }
  0x12   : >> { %s231_s8 = scalar_lea.vmem %s207_s25, %s1382_s7  ;;  %s1317_s10 = scalar_lea.vmem [#allocation2], %s1385_s9 }
  0x13   : >> { %v232_v3 = vld [vmem:[%s231_s8] sm:$0x3]  ;;  %s229_s6 = sadd.s32 1, %s1983_s6  }
  0x14   : >> { %v233_v4 = vunpack.c.l.bf16 %v232_v3  ;;  %p226_p4 = scmp.ge.s32.totalorder %s229_s6, 4  }
  0x15   : > { %s2044_s11 = smov (%p226_p4), 0  }
  0x16   : >> { %v238_v5 = vmul.f32 %v1383_v0, %v233_v4 }
  0x18   : >> { %v243_v6 = vadd.f32 %v1384_v1, %v238_v5 }
  0x1a   : >> { %vm244_vm0 = vcmp.gt.f32.partialorder %v243_v6, 0.0  ;;  %v245_v7 = vmul.f32 0.2, %v243_v6 }
  0x1c   : >> { %v246_v8 = vsel %vm244_vm0, %v243_v6, %v245_v7 }
  0x1d   : >> { %v248_v9 = vrot.slane %v246_v8, 7  ;;  %228 = sbr.rel (!%p226_p4) target bundleno = 17 (0x11), region = 99 }
  0x1f   : >> { %v251_v10 = vsel %vm250_vm1, 0.0, %v248_v9 }
  0x20   : >> { %v253_v11 = vsel %vm252_vm2, %v251_v10, 0.0 }
  0x21   : >> { %v254_v12 = vpack.c.bf16 %v253_v11, %v253_v11 }
  0x23   : >> { %1386 = vst [vmem:[%s1317_s10 + $0x4] sm:$0x7] %v254_v12 }
  0x24 LB: >> { %v1890_v13 = vld [vmem:[%s2381_s2 + $0x40] sm:$0xff]   ;;  %v1990_v14 = vmov 0.0   ;;  %v1892_v16 = vld [vmem:[%s2381_s2 + $0x48] sm:$0xff]   ;;  %vm1991_vm3 = vmmov 0   ;;  %v1894_v18 = vld [vmem:[%s2381_s2 + $0x50] sm:$0xff]   ;;  %s1387_s27 = sshll.u32 %s1987_s11, 2  ;;  %s1987_s11 = sphi %s2044_s11, %s264_s11  }
  0x25   : >> { %1683 = vmatprep.subr.bf16.mxu0 %v1990_v14  ;;  %1703 = vmatprep.subr.bf16.mxu1 %v1990_v14  ;;  %v1891_v15 = vld [vmem:[%s2381_s2] sm:$0xff]   ;;  %v1893_v17 = vld [vmem:[%s2381_s2 + $0x8] sm:$0xff]   ;;  %v1895_v19 = vld [vmem:[%s2381_s2 + $0x10] sm:$0xff]   ;;  %s2096_s10 = scalar_lea.vmem [#allocation2], %s1387_s27  ;;  %s1595_s14 = sshll.u32 %s1987_s11, 1 }
  0x26   : >> { %1684 = vmatpush3.bf16.msra.mxu0 %v1890_v13  ;;  %1699 = vmatprep.mubr.msk.bf16.mxu0 %vm1991_vm3, %v1990_v14  ;;  %v1896_v20 = vld [vmem:[%s2381_s2 + $0x58] sm:$0xff]   ;;  %v1898_v22 = vld [vmem:[%s2381_s2 + $0x60] sm:$0xff]   ;;  %v1900_v26 = vld [vmem:[%s2381_s2 + $0x68] sm:$0xff]   ;;  %s1267_s16 = scalar_lea.vmem %s2037_s28, %s1595_s14  ;;  %s1275_s17 = scalar_lea.vmem %s2042_s5, %s1387_s27 }
  0x27   : >> { %1704 = vmatpush3.bf16.msra.mxu1 %v1891_v15  ;;  %1685 = vmatprep.subr.bf16.mxu0 %v1990_v14  ;;  %v1897_v21 = vld [vmem:[%s2381_s2 + $0x18] sm:$0xff]   ;;  %v1899_v23 = vld [vmem:[%s2381_s2 + $0x20] sm:$0xff]   ;;  %v1901_v27 = vld [vmem:[%s2381_s2 + $0x28] sm:$0xff]   ;;  %s264_s11 = sadd.s32 1, %s1987_s11  }
  0x28   : >> { %1705 = vmatprep.subr.bf16.mxu1 %v1990_v14  ;;  %1719 = vmatprep.mubr.msk.bf16.mxu1 %vm1991_vm3, %v1990_v14  ;;  %v1902_v29 = vld [vmem:[%s2381_s2 + $0x70] sm:$0xff]   ;;  %v1904_v33 = vld [vmem:[%s2381_s2 + $0x78] sm:$0xff]   ;;  %v1907_v36 = vld [vmem:[%s2381_s2 + $0x80] sm:$0xff]   ;;  %p261_p5 = scmp.ge.s32.totalorder %s264_s11, 4  }
  0x29   : >> { %v1903_v30 = vld [vmem:[%s2381_s2 + $0x30] sm:$0xff]   ;;  %v1905_v34 = vld [vmem:[%s2381_s2 + $0x38] sm:$0xff]   ;;  %v1908_v37 = vld [vmem:[%s2381_s2 + $0xc0] sm:$0xff]  }
  0x2a   : >> { %1686 = vmatpush3.bf16.msra.mxu0 %v1892_v16  ;;  %v267_v24 = vld [vmem:[%s2096_s10] sm:$0x7]  ;;  %v1909_v38 = vld [vmem:[%s2381_s2 + $0x88] sm:$0xff]   ;;  %v1911_v40 = vld [vmem:[%s2381_s2 + $0x90] sm:$0xff]  }
  0x2b   : >> { %1706 = vmatpush3.bf16.msra.mxu1 %v1893_v17  ;;  %1687 = vmatprep.subr.bf16.mxu0 %v1990_v14  ;;  %v2099_v25 = vcombine.low %v267_v24, %v267_v24  ;;  %v1910_v39 = vld [vmem:[%s2381_s2 + $0xc8] sm:$0xff]   ;;  %v1912_v41 = vld [vmem:[%s2381_s2 + $0xd0] sm:$0xff]   ;;  %v1913_v42 = vld [vmem:[%s2381_s2 + $0x98] sm:$0xff]  }
  0x2c   : >> { %1707 = vmatprep.subr.bf16.mxu1 %v1990_v14  ;;  %v1914_v43 = vld [vmem:[%s2381_s2 + $0xd8] sm:$0xff]   ;;  %v1915_v44 = vld [vmem:[%s2381_s2 + $0xa0] sm:$0xff]   ;;  %v1917_v46 = vld [vmem:[%s2381_s2 + $0xa8] sm:$0xff]  }
  0x2d   : >> { %v307_v28 = vshll.u32 %v2099_v25, 16  ;;  %v305_v31 = vshrl.u32 %v2099_v25, 16  ;;  %v1916_v45 = vld [vmem:[%s2381_s2 + $0xe0] sm:$0xff]   ;;  %v1918_v47 = vld [vmem:[%s2381_s2 + $0xe8] sm:$0xff]   ;;  %v1919_v48 = vld [vmem:[%s2381_s2 + $0xb0] sm:$0xff]   ;;  %v505_v52 = vrot.slane %v2099_v25, 1 }
  0x2e   : >> { %1688 = vmatpush3.bf16.msra.mxu0 %v1894_v18  ;;  %v1920_v49 = vld [vmem:[%s2381_s2 + $0xf0] sm:$0xff]   ;;  %v1921_v50 = vld [vmem:[%s2381_s2 + $0xb8] sm:$0xff]   ;;  %v1923_v53 = vld [vmem:[%s2381_s2 + $0x100] sm:$0xff]  }
  0x2f   : >> { %1708 = vmatpush3.bf16.msra.mxu1 %v1895_v19  ;;  %1689 = vmatprep.subr.bf16.mxu0 %v1990_v14  ;;  %v309_v32 = vrot.slane %v307_v28, 1  ;;  %v1922_v51 = vld [vmem:[%s2381_s2 + $0xf8] sm:$0xff]   ;;  %v1446_v54 = vld [vmem:[%s2096_s10 + $0x4] sm:$0x7]  ;;  %v1926_v56 = vld [vmem:[%s2381_s2 + $0x108] sm:$0xff]  }
  0x30   : >> { %1709 = vmatprep.subr.bf16.mxu1 %v1990_v14  ;;  %v1925_v55 = vld [vmem:[%s2381_s2 + $0x140] sm:$0xff]   ;;  %v1927_v57 = vld [vmem:[%s2381_s2 + $0x148] sm:$0xff]   ;;  %v1928_v58 = vld [vmem:[%s2381_s2 + $0x110] sm:$0xff]   ;;  %v1487_v0 = vcombine.low %v1446_v54, %v1446_v54 }
  0x31   : >> { %v310_v35 = vor.u32 %v309_v32, %v305_v31  ;;  %v1929_v59 = vld [vmem:[%s2381_s2 + $0x150] sm:$0xff]   ;;  %v1930_v60 = vld [vmem:[%s2381_s2 + $0x118] sm:$0xff]   ;;  %v1932_v62 = vld [vmem:[%s2381_s2 + $0x120] sm:$0xff]  }
  0x32   : >> { %1690 = vmatpush3.bf16.msra.mxu0 %v1896_v20  ;;  %v1931_v61 = vld [vmem:[%s2381_s2 + $0x158] sm:$0xff]   ;;  %v1933_v63 = vld [vmem:[%s2381_s2 + $0x160] sm:$0xff]   ;;  %v1934_v1 = vld [vmem:[%s2381_s2 + $0x128] sm:$0xff]   ;;  %v729_v3 = vshll.u32 %v1487_v0, 16  ;;  %v727_v6 = vshrl.u32 %v1487_v0, 16  ;;  %v840_v12 = vrot.slane %v1487_v0, 1 }
  0x33   : >> { %1710 = vmatpush3.bf16.msra.mxu1 %v1897_v21  ;;  %1691 = vmatprep.subr.bf16.mxu0 %v1990_v14  ;;  %v1935_v2 = vld [vmem:[%s2381_s2 + $0x168] sm:$0xff]   ;;  %v1936_v4 = vld [vmem:[%s2381_s2 + $0x130] sm:$0xff]   ;;  %v1938_v8 = vld [vmem:[%s2381_s2 + $0x138] sm:$0xff]  }
  0x34   : >> { %1711 = vmatprep.subr.bf16.mxu1 %v1990_v14  ;;  %v1937_v5 = vld [vmem:[%s2381_s2 + $0x170] sm:$0xff]   ;;  %v731_v7 = vrot.slane %v729_v3, 1  ;;  %v1939_v9 = vld [vmem:[%s2381_s2 + $0x178] sm:$0xff]   ;;  %v1940_v11 = vld [vmem:[%s2381_s2 + $0x180] sm:$0xff]  }
  0x35   : >> { %v1941_v13 = vld [vmem:[%s2381_s2 + $0x1c0] sm:$0xff]   ;;  %v1942_v15 = vld [vmem:[%s2381_s2 + $0x188] sm:$0xff]   ;;  %v1944_v17 = vld [vmem:[%s2381_s2 + $0x190] sm:$0xff]  }
  0x36   : >> { %1692 = vmatpush3.bf16.msra.mxu0 %v1898_v22  ;;  %v732_v10 = vor.u32 %v731_v7, %v727_v6  ;;  %v1943_v16 = vld [vmem:[%s2381_s2 + $0x1c8] sm:$0xff]   ;;  %v1945_v18 = vld [vmem:[%s2381_s2 + $0x1d0] sm:$0xff]   ;;  %v1946_v19 = vld [vmem:[%s2381_s2 + $0x198] sm:$0xff]  }
  0x37   : >> { %1712 = vmatpush3.bf16.msra.mxu1 %v1899_v23  ;;  %1693 = vmatprep.subr.bf16.mxu0 %v1990_v14  ;;  %v1947_v20 = vld [vmem:[%s2381_s2 + $0x1d8] sm:$0xff]   ;;  %v1948_v21 = vld [vmem:[%s2381_s2 + $0x1a0] sm:$0xff]   ;;  %v1521_v23 = vld [vmem:[%s2096_s10 + $0x8] sm:$0x7] }
  0x38   : >> { %1713 = vmatprep.subr.bf16.mxu1 %v1990_v14  ;;  %v1949_v22 = vld [vmem:[%s2381_s2 + $0x1e0] sm:$0xff]   ;;  %v1562_v25 = vcombine.low %v1521_v23, %v1521_v23 }
  0x3a   : >> { %1694 = vmatpush3.bf16.msra.mxu0 %v1900_v26  ;;  %v1951_v26 = vld [vmem:[%s2381_s2 + $0x1e8] sm:$0xff]   ;;  %v1064_v28 = vshll.u32 %v1562_v25, 16  ;;  %v1062_v31 = vshrl.u32 %v1562_v25, 16 }
  0x3b   : >> { %1714 = vmatpush3.bf16.msra.mxu1 %v1901_v27  ;;  %1695 = vmatprep.subr.bf16.mxu0 %v1990_v14  ;;  %v1952_v27 = vld [vmem:[%s2381_s2 + $0x1b0] sm:$0xff]  }
  0x3c   : >> { %1715 = vmatprep.subr.bf16.mxu1 %v1990_v14  ;;  %v1066_v32 = vrot.slane %v1064_v28, 1 }
  0x3e   : >> { %1696 = vmatpush3.bf16.msra.mxu0 %v1902_v29  ;;  %v1953_v29 = vld [vmem:[%s2381_s2 + $0x1f0] sm:$0xff]  }
  0x3f   : >> { %1716 = vmatpush3.bf16.msra.mxu1 %v1903_v30  ;;  %1697 = vmatprep.subr.bf16.mxu0 %v1990_v14  ;;  %v1954_v30 = vld [vmem:[%s2381_s2 + $0x1b8] sm:$0xff]  }
  0x40   : >> { %1717 = vmatprep.subr.bf16.mxu1 %v1990_v14 }
  0x42   : >> { %1698 = vmatpush3.bf16.msra.mxu0 %v1904_v33  ;;  %v1955_v33 = vld [vmem:[%s2381_s2 + $0x1f8] sm:$0xff]  }
  0x43   : >> { %1718 = vmatpush3.bf16.msra.mxu1 %v1905_v34  ;;  %1723 = vmatprep.subr.bf16.mxu0 %v1990_v14  ;;  %v1957_v34 = vld [vmem:[%s2381_s2 + $0x200] sm:$0xff]  }
  0x44   : >> { %1743 = vmatprep.subr.bf16.mxu1 %v1990_v14 }
  0x45   : >> { %1700 = vmatmul.mubr.bf16.vlgmr.msra.gmra.mrb[0].mxu0 %v310_v35  ;;  %v1067_v35 = vor.u32 %v1066_v32, %v1062_v31 }
  0x46   : >> { %1720 = vmatmul.mubr.bf16.vlgmr.msra.gmra.mrb[0].mxu1 %v267_v24  ;;  %1724 = vmatpush3.bf16.msra.mxu0 %v1907_v36  ;;  %v1950_v24 = vld [vmem:[%s2381_s2 + $0x1a8] sm:$0xff]  }
  0x47   : >> { %1744 = vmatpush3.bf16.msra.mxu1 %v1908_v37  ;;  %1725 = vmatprep.subr.bf16.mxu0 %v1990_v14  ;;  %v1958_v36 = vld [vmem:[%s2381_s2 + $0x208] sm:$0xff]   ;;  %v1959_v37 = vld [vmem:[%s2381_s2 + $0x210] sm:$0xff]  }
  0x48   : >> { %1745 = vmatprep.subr.bf16.mxu1 %v1990_v14  ;;  %1739 = vmatprep.mubr.msk.bf16.mxu0 %vm1991_vm3, %v1990_v14 }
  0x49   : >> { %1759 = vmatprep.mubr.msk.bf16.mxu1 %vm1991_vm3, %v1990_v14 }
  0x4a   : >> { %1726 = vmatpush3.bf16.msra.mxu0 %v1909_v38  ;;  %v1960_v38 = vld [vmem:[%s2381_s2 + $0x218] sm:$0xff]  }
  0x4b   : >> { %1746 = vmatpush3.bf16.msra.mxu1 %v1910_v39  ;;  %1727 = vmatprep.subr.bf16.mxu0 %v1990_v14  ;;  %v1961_v39 = vld [vmem:[%s2381_s2 + $0x220] sm:$0xff]  }
  0x4c   : >> { %1747 = vmatprep.subr.bf16.mxu1 %v1990_v14 }
  0x4e   : >> { %1728 = vmatpush3.bf16.msra.mxu0 %v1911_v40  ;;  %v1962_v40 = vld [vmem:[%s2381_s2 + $0x228] sm:$0xff]  }
  0x4f   : >> { %1748 = vmatpush3.bf16.msra.mxu1 %v1912_v41  ;;  %1729 = vmatprep.subr.bf16.mxu0 %v1990_v14  ;;  %v1963_v41 = vld [vmem:[%s2381_s2 + $0x230] sm:$0xff]  }
  0x50   : >> { %1749 = vmatprep.subr.bf16.mxu1 %v1990_v14 }
  0x52   : >> { %1730 = vmatpush3.bf16.msra.mxu0 %v1913_v42  ;;  %v1964_v42 = vld [vmem:[%s2381_s2 + $0x238] sm:$0xff]  }
  0x53   : >> { %1750 = vmatpush3.bf16.msra.mxu1 %v1914_v43  ;;  %1731 = vmatprep.subr.bf16.mxu0 %v1990_v14  ;;  %v1175_v43 = vrot.slane %v1562_v25, 1 }
  0x54   : >> { %1751 = vmatprep.subr.bf16.mxu1 %v1990_v14 }
  0x56   : >> { %1732 = vmatpush3.bf16.msra.mxu0 %v1915_v44 }
  0x57   : >> { %1752 = vmatpush3.bf16.msra.mxu1 %v1916_v45  ;;  %1733 = vmatprep.subr.bf16.mxu0 %v1990_v14 }
  0x58   : >> { %1753 = vmatprep.subr.bf16.mxu1 %v1990_v14 }
  0x5a   : >> { %1734 = vmatpush3.bf16.msra.mxu0 %v1917_v46 }
  0x5b   : >> { %1754 = vmatpush3.bf16.msra.mxu1 %v1918_v47  ;;  %1735 = vmatprep.subr.bf16.mxu0 %v1990_v14 }
  0x5c   : >> { %1755 = vmatprep.subr.bf16.mxu1 %v1990_v14 }
  0x5e   : >> { %1736 = vmatpush3.bf16.msra.mxu0 %v1919_v48 }
  0x5f   : >> { %1756 = vmatpush3.bf16.msra.mxu1 %v1920_v49  ;;  %1737 = vmatprep.subr.bf16.mxu0 %v1990_v14 }
  0x60   : >> { %1757 = vmatprep.subr.bf16.mxu1 %v1990_v14 }
  0x62   : >> { %1738 = vmatpush3.bf16.msra.mxu0 %v1921_v50 }
  0x63   : >> { %1758 = vmatpush3.bf16.msra.mxu1 %v1922_v51  ;;  %1763 = vmatprep.subr.bf16.mxu0 %v1990_v14 }
  0x64   : >> { %1783 = vmatprep.subr.bf16.mxu1 %v1990_v14 }
  0x65   : >> { %1740 = vmatmul.mubr.bf16.vlgmr.msra.gmra.mrb[4].mxu0 %v505_v52 }
  0x66   : >> { %1764 = vmatpush3.bf16.msra.mxu0 %v1923_v53  ;;  %1760 = vmatmul.mubr.bf16.vlgmr.msra.gmra.mrb[4].mxu1 %v1446_v54 }
  0x67   : >> { %1784 = vmatpush3.bf16.msra.mxu1 %v1925_v55  ;;  %1765 = vmatprep.subr.bf16.mxu0 %v1990_v14 }
  0x68   : >> { %1785 = vmatprep.subr.bf16.mxu1 %v1990_v14  ;;  %1779 = vmatprep.mubr.msk.bf16.mxu0 %vm1991_vm3, %v1990_v14 }
  0x69   : >> { %1799 = vmatprep.mubr.msk.bf16.mxu1 %vm1991_vm3, %v1990_v14 }
  0x6a   : >> { %1766 = vmatpush3.bf16.msra.mxu0 %v1926_v56 }
  0x6b   : >> { %1786 = vmatpush3.bf16.msra.mxu1 %v1927_v57  ;;  %1767 = vmatprep.subr.bf16.mxu0 %v1990_v14 }
  0x6c   : >> { %1787 = vmatprep.subr.bf16.mxu1 %v1990_v14 }
  0x6e   : >> { %1768 = vmatpush3.bf16.msra.mxu0 %v1928_v58 }
  0x6f   : >> { %1788 = vmatpush3.bf16.msra.mxu1 %v1929_v59  ;;  %1769 = vmatprep.subr.bf16.mxu0 %v1990_v14 }
  0x70   : >> { %1789 = vmatprep.subr.bf16.mxu1 %v1990_v14 }
  0x72   : >> { %1770 = vmatpush3.bf16.msra.mxu0 %v1930_v60 }
  0x73   : >> { %1790 = vmatpush3.bf16.msra.mxu1 %v1931_v61  ;;  %1771 = vmatprep.subr.bf16.mxu0 %v1990_v14 }
  0x74   : >> { %1791 = vmatprep.subr.bf16.mxu1 %v1990_v14 }
  0x76   : >> { %1772 = vmatpush3.bf16.msra.mxu0 %v1932_v62 }
  0x77   : >> { %1792 = vmatpush3.bf16.msra.mxu1 %v1933_v63  ;;  %1773 = vmatprep.subr.bf16.mxu0 %v1990_v14 }
  0x78   : >> { %1793 = vmatprep.subr.bf16.mxu1 %v1990_v14 }
  0x7a   : >> { %1774 = vmatpush3.bf16.msra.mxu0 %v1934_v1 }
  0x7b   : >> { %1794 = vmatpush3.bf16.msra.mxu1 %v1935_v2  ;;  %1775 = vmatprep.subr.bf16.mxu0 %v1990_v14 }
  0x7c   : >> { %1795 = vmatprep.subr.bf16.mxu1 %v1990_v14 }
  0x7e   : >> { %1776 = vmatpush3.bf16.msra.mxu0 %v1936_v4 }
  0x7f   : >> { %1796 = vmatpush3.bf16.msra.mxu1 %v1937_v5  ;;  %1777 = vmatprep.subr.bf16.mxu0 %v1990_v14 }
  0x80   : >> { %1797 = vmatprep.subr.bf16.mxu1 %v1990_v14 }
  0x82   : >> { %1778 = vmatpush3.bf16.msra.mxu0 %v1938_v8 }
  0x83   : >> { %1798 = vmatpush3.bf16.msra.mxu1 %v1939_v9  ;;  %1803 = vmatprep.subr.bf16.mxu0 %v1990_v14 }
  0x84   : >> { %1823 = vmatprep.subr.bf16.mxu1 %v1990_v14 }
  0x85   : >> { %1780 = vmatmul.mubr.bf16.vlgmr.msra.gmra.mrb[8].mxu0 %v732_v10 }
  0x86   : >> { %1804 = vmatpush3.bf16.msra.mxu0 %v1940_v11  ;;  %1800 = vmatmul.mubr.bf16.vlgmr.msra.gmra.mrb[8].mxu1 %v840_v12 }
  0x87   : >> { %1824 = vmatpush3.bf16.msra.mxu1 %v1941_v13  ;;  %1805 = vmatprep.subr.bf16.mxu0 %v1990_v14 }
  0x88   : >> { %1825 = vmatprep.subr.bf16.mxu1 %v1990_v14  ;;  %1819 = vmatprep.mubr.msk.bf16.mxu0 %vm1991_vm3, %v1990_v14 }
  0x89   : >> { %1839 = vmatprep.mubr.msk.bf16.mxu1 %vm1991_vm3, %v1990_v14 }
  0x8a   : >> { %1806 = vmatpush3.bf16.msra.mxu0 %v1942_v15 }
  0x8b   : >> { %1826 = vmatpush3.bf16.msra.mxu1 %v1943_v16  ;;  %1807 = vmatprep.subr.bf16.mxu0 %v1990_v14 }
  0x8c   : >> { %1827 = vmatprep.subr.bf16.mxu1 %v1990_v14 }
  0x8e   : >> { %1808 = vmatpush3.bf16.msra.mxu0 %v1944_v17 }
  0x8f   : >> { %1828 = vmatpush3.bf16.msra.mxu1 %v1945_v18  ;;  %1809 = vmatprep.subr.bf16.mxu0 %v1990_v14 }
  0x90   : >> { %1829 = vmatprep.subr.bf16.mxu1 %v1990_v14 }
  0x92   : >> { %1810 = vmatpush3.bf16.msra.mxu0 %v1946_v19  ;;  %v1268_v19 = vld [vmem:[%s1267_s16] sm:$0x3] }
  0x93   : >> { %1830 = vmatpush3.bf16.msra.mxu1 %v1947_v20  ;;  %1811 = vmatprep.subr.bf16.mxu0 %v1990_v14  ;;  %v1269_v20 = vunpack.c.l.bf16 %v1268_v19 }
  0x94   : >> { %1831 = vmatprep.subr.bf16.mxu1 %v1990_v14 }
  0x96   : >> { %1812 = vmatpush3.bf16.msra.mxu0 %v1948_v21 }
  0x97   : >> { %1832 = vmatpush3.bf16.msra.mxu1 %v1949_v22  ;;  %1813 = vmatprep.subr.bf16.mxu0 %v1990_v14 }
  0x98   : >> { %1833 = vmatprep.subr.bf16.mxu1 %v1990_v14 }
  0x9a   : >> { %1814 = vmatpush3.bf16.msra.mxu0 %v1950_v24 }
  0x9b   : >> { %1834 = vmatpush3.bf16.msra.mxu1 %v1951_v26  ;;  %1815 = vmatprep.subr.bf16.mxu0 %v1990_v14 }
  0x9c   : >> { %1835 = vmatprep.subr.bf16.mxu1 %v1990_v14 }
  0x9e   : >> { %1816 = vmatpush3.bf16.msra.mxu0 %v1952_v27 }
  0x9f   : >> { %1836 = vmatpush3.bf16.msra.mxu1 %v1953_v29  ;;  %1817 = vmatprep.subr.bf16.mxu0 %v1990_v14 }
  0xa0   : >> { %1837 = vmatprep.subr.bf16.mxu1 %v1990_v14 }
  0xa2   : >> { %1818 = vmatpush3.bf16.msra.mxu0 %v1954_v30 }
  0xa3   : >> { %1838 = vmatpush3.bf16.msra.mxu1 %v1955_v33  ;;  %1843 = vmatprep.subr.bf16.mxu0 %v1990_v14 }
  0xa5   : >> { %1820 = vmatmul.mubr.bf16.vlgmr.msra.gmra.mrb[12].mxu0 %v1521_v23 }
  0xa6   : >> { %1844 = vmatpush3.bf16.msra.mxu0 %v1957_v34  ;;  %1840 = vmatmul.mubr.bf16.vlgmr.msra.gmra.mrb[12].mxu1 %v1067_v35 }
  0xa7   : >> { %1845 = vmatprep.subr.bf16.mxu0 %v1990_v14  ;;  %1859 = vmatprep.mubr.msk.bf16.mxu0 %vm1991_vm3, %v1990_v14 }
  0xaa   : >> { %1846 = vmatpush3.bf16.msra.mxu0 %v1958_v36 }
  0xab   : >> { %1847 = vmatprep.subr.bf16.mxu0 %v1990_v14 }
  0xae   : >> { %1848 = vmatpush3.bf16.msra.mxu0 %v1959_v37 }
  0xaf   : >> { %1849 = vmatprep.subr.bf16.mxu0 %v1990_v14 }
  0xb2   : >> { %1850 = vmatpush3.bf16.msra.mxu0 %v1960_v38 }
  0xb3   : >> { %1851 = vmatprep.subr.bf16.mxu0 %v1990_v14 }
  0xb6   : >> { %1852 = vmatpush3.bf16.msra.mxu0 %v1961_v39 }
  0xb7   : >> { %1853 = vmatprep.subr.bf16.mxu0 %v1990_v14 }
  0xba   : >> { %1854 = vmatpush3.bf16.msra.mxu0 %v1962_v40 }
  0xbb   : >> { %1855 = vmatprep.subr.bf16.mxu0 %v1990_v14 }
  0xbe   : >> { %1856 = vmatpush3.bf16.msra.mxu0 %v1963_v41 }
  0xbf   : >> { %1857 = vmatprep.subr.bf16.mxu0 %v1990_v14 }
  0xc2   : >> { %1858 = vmatpush3.bf16.msra.mxu0 %v1964_v42 }
  0xc5   : >> { %1860 = vmatmul.mubr.bf16.vlgmr.msra.gmra.mrb[16].mxu0 %v1175_v43 }
 0x118   : >> { %v394_v44 = vpop.f32.mrb[0].mxu0 }
 0x119   : >> { %v1701_v45 = vpop.f32.mrb[1].mxu0  ;;  %v482_v46 = vpop.f32.mrb[0].mxu1 }
 0x11a   : >> { %v483_v47 = vadd.f32 %v482_v46, %v394_v44  ;;  %v397_v48 = vpop.f32.mrb[2].mxu0  ;;  %v1721_v49 = vpop.f32.mrb[1].mxu1 }
 0x11b   : >> { %v1702_v50 = vpop.f32.mrb[3].mxu0  ;;  %v485_v51 = vpop.f32.mrb[2].mxu1 }
 0x11c   : >> { %v1722_v52 = vpop.f32.mrb[3].mxu1 }
 0x138   : >> { %v589_v53 = vpop.f32.mrb[4].mxu0 }
 0x139   : >> { %v595_v54 = vadd.f32 %v589_v53, %v483_v47  ;;  %v1741_v55 = vpop.f32.mrb[5].mxu0  ;;  %v699_v56 = vpop.f32.mrb[4].mxu1 }
 0x13a   : >> { %v592_v57 = vpop.f32.mrb[6].mxu0  ;;  %v1761_v58 = vpop.f32.mrb[5].mxu1 }
 0x13b   : >> { %v705_v59 = vadd.f32 %v699_v56, %v595_v54  ;;  %v1742_v14 = vpop.f32.mrb[7].mxu0  ;;  %v702_v60 = vpop.f32.mrb[6].mxu1 }
 0x13c   : >> { %v1762_v61 = vpop.f32.mrb[7].mxu1 }
 0x158   : >> { %v816_v62 = vpop.f32.mrb[8].mxu0 }
 0x159   : >> { %v822_v63 = vadd.f32 %v816_v62, %v705_v59  ;;  %v1781_v0 = vpop.f32.mrb[9].mxu0  ;;  %v924_v1 = vpop.f32.mrb[8].mxu1 }
 0x15a   : >> { %v819_v2 = vpop.f32.mrb[10].mxu0  ;;  %v1801_v3 = vpop.f32.mrb[9].mxu1 }
 0x15b   : >> { %v930_v4 = vadd.f32 %v924_v1, %v822_v63  ;;  %v1782_v5 = vpop.f32.mrb[11].mxu0  ;;  %v927_v6 = vpop.f32.mrb[10].mxu1 }
 0x15c   : >> { %v1802_v7 = vpop.f32.mrb[11].mxu1 }
 0x178   : >> { %v1034_v8 = vpop.f32.mrb[12].mxu0 }
 0x179   : >> { %v1040_v9 = vadd.f32 %v1034_v8, %v930_v4  ;;  %v1821_v10 = vpop.f32.mrb[13].mxu0  ;;  %v1151_v11 = vpop.f32.mrb[12].mxu1 }
 0x17a   : >> { %v1037_v12 = vpop.f32.mrb[14].mxu0  ;;  %v1841_v13 = vpop.f32.mrb[13].mxu1 }
 0x17b   : >> { %v1157_v15 = vadd.f32 %v1151_v11, %v1040_v9  ;;  %v1822_v16 = vpop.f32.mrb[15].mxu0  ;;  %v1154_v17 = vpop.f32.mrb[14].mxu1 }
 0x17c   : >> { %v1842_v18 = vpop.f32.mrb[15].mxu1 }
 0x198   : >> { %v1259_v21 = vpop.f32.mrb[16].mxu0 }
 0x199   : >> { %v1265_v22 = vadd.f32 %v1259_v21, %v1157_v15  ;;  %v1861_v23 = vpop.f32.mrb[17].mxu0 }
 0x19a   : >> { %v1262_v24 = vpop.f32.mrb[18].mxu0  ;;  %263 = sbr.rel (!%p261_p5) target bundleno = 36 (0x24), region = 110 }
 0x19b   : >> { %v1270_v25 = vadd.f32 %v1269_v20, %v1265_v22  ;;  %v1862_v26 = vpop.f32.mrb[19].mxu0 }
 0x19d   : >> { %vm1271_vm4 = vcmp.gt.f32.partialorder %v1270_v25, 0.0  ;;  %v1272_v27 = vmul.f32 0.2, %v1270_v25 }
 0x19f   : >> { %v1273_v28 = vsel %vm1271_vm4, %v1270_v25, %v1272_v27 }
 0x1a0   : >> { %1276 = vst [vmem:[%s1275_s17] sm:$0xf] %v1273_v28 }
 0x1a1 PF: > { %s14_s15 = sadd.s32 1, %s1979_s15  }
 0x1a2   : > { %p11_p6 = scmp.ge.s32.totalorder %s14_s15, 4  }
 0x1a4   :  { %13 = sbr.rel (!%p11_p6) target bundleno = 1 (0x1), region = 121 }

</bundles_post_ra>
